<compile_context>
chip_gen: v7x
topology: tpu7x:2x2x1
jax: 0.10.0
libtpu: 0.0.40
codegen_flags: <defaults>
</compile_context>

<pallas_src>
import functools

import jax
import jax.numpy as jnp
from jax import lax
from jax.experimental import pallas as pl
from jax.experimental.pallas import tpu as pltpu


def _round_up(x: int, m: int) -> int:
    return pl.cdiv(x, m) * m


def _self_output_kernel(x_ref, res_ref, wt_ref, b_ref, g_ref, beta_ref, o_ref,
                        *, eps: float):
    # x_ref:    (bm, H)  block of hidden_states (flattened rows)
    # res_ref:  (bm, H)  block of input_tensor (residual)
    # wt_ref:   (H, H)   dense weight, pre-transposed so y = x @ wt
    # b_ref:    (1, H)   dense bias         (f32, cast once in the wrapper)
    # g_ref:    (1, H)   LayerNorm gamma    (f32)
    # beta_ref: (1, H)   LayerNorm beta     (f32)

    # Dense: native-dtype operands on the MXU, f32 accumulation.
    y = jnp.dot(x_ref[...], wt_ref[...], preferred_element_type=jnp.float32)

    # Dropout: module evaluated in inference mode -> identity.
    # TODO(synk): training-mode dropout (pltpu.prng_* mask + scale) not implemented.

    # Residual add (+ bias) in f32.
    z = y + b_ref[...] + res_ref[...].astype(jnp.float32)

    # One-pass LayerNorm statistics over the hidden (last) axis, in f32:
    #   var = E[z^2] - mean^2  (clamped at 0 against cancellation).
    mean = jnp.mean(z, axis=-1, keepdims=True)
    ex2 = jnp.mean(z * z, axis=-1, keepdims=True)
    var = jnp.maximum(ex2 - mean * mean, 0.0)
    inv = lax.rsqrt(var + eps)

    # Fused affine epilogue (single elementwise pass, no `centered` temp kept
    # around for a second reduction).
    o_ref[...] = ((z - mean) * inv * g_ref[...] + beta_ref[...]).astype(o_ref.dtype)


def layoutlmv2_self_output(hidden_states, input_tensor, w_t, b, gamma, beta,
                           *, eps: float = 1e-12, block_rows: int = 512):
    """Fused Linear + residual + LayerNorm (LayoutLMv2SelfOutput, inference).

    hidden_states, input_tensor: (B, S, H)
    w_t:   (H, H)  dense weight ALREADY transposed (y = x @ w_t); transpose the
           nn.Linear (out, in) weight once at parameter-setup time, not per call.
    b, gamma, beta: (H,)

    For inference on v5e (and to halve HBM traffic on v6e/v7x), cast w_t and
    the activations to bf16 at parameter-setup time; the f32 accumulation and
    f32 LayerNorm epilogue inside the kernel are unchanged.
    """
    B, S, H = hidden_states.shape
    assert w_t.shape == (H, H)
    M = B * S

    x2d = hidden_states.reshape(M, H)
    r2d = input_tensor.reshape(M, H)
    # Cast the small per-channel params to f32 once here so the kernel epilogue
    # is pure f32 (no per-tile casts of these vectors).
    b2d = b.reshape(1, H).astype(jnp.float32)
    g2d = gamma.reshape(1, H).astype(jnp.float32)
    beta2d = beta.reshape(1, H).astype(jnp.float32)

    act_itemsize = jnp.dtype(hidden_states.dtype).itemsize
    w_itemsize = jnp.dtype(w_t.dtype).itemsize
    # Sublane packing of the activation dtype: 8 rows for f32, 16 for bf16.
    row_align = max(8, 32 // act_itemsize)

    block_rows = max(row_align, _round_up(block_rows, row_align))
    if M > block_rows:
        bm = block_rows
    else:
        # Small problem: split into >= 2 grid steps so ("parallel",) can shard
        # the rows across both v7x TensorCores instead of leaving one idle.
        bm = min(_round_up(pl.cdiv(M, 2), row_align), _round_up(M, row_align))
    grid = pl.cdiv(M, bm)
    # NOTE: no jnp.pad / output slice — the partial tail block (if any) reads
    # unspecified rows and its OOB writes are discarded; the epilogue is
    # strictly row-wise, so valid rows are unaffected.

    # Generation-aware VMEM budget (v5e/v6e: 128 MiB, v7x: 64 MiB per TC).
    try:
        vmem_cap = int(pltpu.get_tpu_info().vmem_capacity_bytes)
    except Exception:
        vmem_cap = 64 * 1024 * 1024
    vmem_ceiling = (vmem_cap * 7) // 8  # headroom for compiler-internal scratch

    def est_bytes(single_buffer_consts: bool) -> int:
        n_const_bufs = 1 if single_buffer_consts else 2
        return (2 * 2 * bm * H * act_itemsize                     # x + residual tiles, double-buffered
                + 2 * bm * H * act_itemsize                       # output tile, double-buffered
                + n_const_bufs * (H * H * w_itemsize + 3 * H * 4)  # resident weight + bias/gamma/beta
                + 5 * bm * H * 4)                                 # f32 intermediates (y/z, z*z, norm, ...)

    kernel = functools.partial(_self_output_kernel, eps=eps)

    def build(single_buffer_consts: bool):
        if single_buffer_consts:
            def const_spec(shape):
                # Constant index_map -> never re-DMA'd; single-buffer to halve
                # the resident footprint (most valuable under v7x's 64 MiB).
                return pl.BlockSpec(shape, lambda i: (0, 0),
                                    pipeline_mode=pl.Buffered(1))
        else:
            def const_spec(shape):
                return pl.BlockSpec(shape, lambda i: (0, 0))

        vmem_limit = int(min(max(int(1.15 * est_bytes(single_buffer_consts)),
                                 32 * 1024 * 1024),
                             vmem_ceiling))

        return pl.pallas_call(
            kernel,
            out_shape=jax.ShapeDtypeStruct((M, H), hidden_states.dtype),
            grid_spec=pltpu.PrefetchScalarGridSpec(
                num_scalar_prefetch=0,
                grid=(grid,),
                in_specs=[
                    pl.BlockSpec((bm, H), lambda i: (i, 0)),   # x rows
                    pl.BlockSpec((bm, H), lambda i: (i, 0)),   # residual rows
                    const_spec((H, H)),                        # weight (resident)
                    const_spec((1, H)),                        # bias
                    const_spec((1, H)),                        # gamma
                    const_spec((1, H)),                        # beta
                ],
                out_specs=pl.BlockSpec((bm, H), lambda i: (i, 0)),
            ),
            compiler_params=pltpu.CompilerParams(
                # Row axis is embarrassingly parallel -> megacore / 2-TC sharding.
                dimension_semantics=("parallel",),
                vmem_limit_bytes=vmem_limit),
        )

    args = (x2d, r2d, w_t, b2d, g2d, beta2d)
    try:
        out2d = build(True)(*args)
    except Exception:
        # Fallback if single-buffering via pl.Buffered(1) is not supported on
        # this build: use default (double) buffering for the resident params.
        out2d = build(False)(*args)

    return out2d.reshape(B, S, H)


def _reference(hidden_states, input_tensor, w, b, gamma, beta, eps=1e-12):
    # w is the nn.Linear weight with shape (out_features, in_features).
    hs = hidden_states.astype(jnp.float32)
    it = input_tensor.astype(jnp.float32)
    y = jnp.einsum("bsh,oh->bso", hs, w.astype(jnp.float32)) + b
    z = y + it
    mean = jnp.mean(z, axis=-1, keepdims=True)
    var = jnp.mean((z - mean) ** 2, axis=-1, keepdims=True)
    return (z - mean) * lax.rsqrt(var + eps) * gamma + beta


if __name__ == "__main__":
    key = jax.random.PRNGKey(0)
    # M = B*S = 144: deliberately NOT a multiple of any tile size to exercise
    # the un-padded ragged-tail path; H = 128 = one full lane width.
    B, S, H = 2, 72, 128
    eps = 1e-12

    k1, k2, k3, k4, k5, k6 = jax.random.split(key, 6)
    hidden_states = jax.random.normal(k1, (B, S, H), dtype=jnp.float32)
    input_tensor = jax.random.normal(k2, (B, S, H), dtype=jnp.float32)

    # Deterministic synthetic parameters (not a checkpoint load).
    w = jax.random.normal(k3, (H, H), dtype=jnp.float32) * 0.02   # nn.Linear (out, in)
    w_t = jnp.asarray(w.T)                                        # transpose ONCE at setup
    b = jax.random.normal(k4, (H,), dtype=jnp.float32) * 0.02
    gamma = 1.0 + 0.1 * jax.random.normal(k5, (H,), dtype=jnp.float32)
    beta = 0.1 * jax.random.normal(k6, (H,), dtype=jnp.float32)

    ref = _reference(hidden_states, input_tensor, w, b, gamma, beta, eps=eps)

    # 1) Default path: M (144) < block_rows (512) -> tile is split so the grid
    #    has 2 steps (both v7x TensorCores busy).
    out_default = layoutlmv2_self_output(
        hidden_states, input_tensor, w_t, b, gamma, beta, eps=eps)
    out_default = jax.block_until_ready(out_default)
    assert out_default.shape == (B, S, H)
    assert jnp.allclose(out_default, ref, atol=5e-3, rtol=5e-3), \
        "mismatch vs reference (default tile)"

    # 2) Small tile: grid = 3 with a partial tail block (no jnp.pad, tail rows
    #    handled in-kernel / discarded writes).
    out_tiled = layoutlmv2_self_output(
        hidden_states, input_tensor, w_t, b, gamma, beta, eps=eps, block_rows=64)
    out_tiled = jax.block_until_ready(out_tiled)
    assert out_tiled.shape == (B, S, H)
    assert jnp.allclose(out_tiled, ref, atol=5e-3, rtol=5e-3), \
        "mismatch vs reference (64-row tile, ragged tail)"

    # 3) bf16 inference path (recommended on v5e; halves HBM traffic on
    #    v6e/v7x): native-dtype MXU operands, f32 accumulation + f32 LayerNorm.
    hs_bf = hidden_states.astype(jnp.bfloat16)
    it_bf = input_tensor.astype(jnp.bfloat16)
    wt_bf = w_t.astype(jnp.bfloat16)
    out_bf = layoutlmv2_self_output(hs_bf, it_bf, wt_bf, b, gamma, beta, eps=eps)
    out_bf = jax.block_until_ready(out_bf)
    assert out_bf.dtype == jnp.bfloat16 and out_bf.shape == (B, S, H)
    ref_bf = _reference(hs_bf, it_bf, wt_bf.T, b, gamma, beta, eps=eps)
    assert jnp.allclose(out_bf.astype(jnp.float32), ref_bf, atol=3e-2, rtol=3e-2), \
        "mismatch vs reference (bf16 path)"

    print("KERNEL_OK")
</pallas_src>

<mosaic_0001>
module attributes {stable_mosaic.version = 11 : i64} {
  func.func @_self_output_kernel(%arg0: i32, %arg1: memref<72x128xf32, #tpu.memory_space<vmem>>, %arg2: memref<72x128xf32, #tpu.memory_space<vmem>>, %arg3: memref<128x128xf32, #tpu.memory_space<vmem>>, %arg4: memref<1x128xf32, #tpu.memory_space<vmem>>, %arg5: memref<1x128xf32, #tpu.memory_space<vmem>>, %arg6: memref<1x128xf32, #tpu.memory_space<vmem>>, %arg7: memref<72x128xf32, #tpu.memory_space<vmem>>) attributes {dimension_semantics = [#tpu.dimension_semantics<parallel>], iteration_bounds = array<i64: 2>, scalar_prefetch = 0 : i64, scratch_operands = 0 : i64, tpu.core_type = #tpu.core_type<tc>, window_params = [{transform_indices = @transform_0, window_bounds = array<i64: 72, 128>}, {transform_indices = @transform_1, window_bounds = array<i64: 72, 128>}, {pipeline_mode = #tpu.pipeline_mode<synchronous>, transform_indices = @transform_2, window_bounds = array<i64: 128, 128>}, {pipeline_mode = #tpu.pipeline_mode<synchronous>, transform_indices = @transform_3, window_bounds = array<i64: 1, 128>}, {pipeline_mode = #tpu.pipeline_mode<synchronous>, transform_indices = @transform_4, window_bounds = array<i64: 1, 128>}, {pipeline_mode = #tpu.pipeline_mode<synchronous>, transform_indices = @transform_5, window_bounds = array<i64: 1, 128>}, {transform_indices = @transform_6, window_bounds = array<i64: 72, 128>}]} {
    %c0 = arith.constant 0 : index
    %c0_0 = arith.constant 0 : index
    %0 = vector.load %arg1[%c0, %c0_0] : memref<72x128xf32, #tpu.memory_space<vmem>>, vector<72x128xf32>
    %c0_1 = arith.constant 0 : index
    %c0_2 = arith.constant 0 : index
    %1 = vector.load %arg3[%c0_1, %c0_2] : memref<128x128xf32, #tpu.memory_space<vmem>>, vector<128x128xf32>
    %cst = arith.constant dense<0.000000e+00> : vector<72x128xf32>
    %2 = tpu.matmul %0, %1, %cst {dimension_numbers = #tpu.dot_dimension_numbers<[1], [0], [0], [1], [0, 0, 1, 1], [], []>} : vector<72x128xf32>, vector<128x128xf32>, vector<72x128xf32> -> vector<72x128xf32>
    %c0_3 = arith.constant 0 : index
    %c0_4 = arith.constant 0 : index
    %3 = vector.load %arg4[%c0_3, %c0_4] : memref<1x128xf32, #tpu.memory_space<vmem>>, vector<1x128xf32>
    %4 = vector.broadcast %3 : vector<1x128xf32> to vector<72x128xf32>
    %5 = arith.addf %2, %4 : vector<72x128xf32>
    %c0_5 = arith.constant 0 : index
    %c0_6 = arith.constant 0 : index
    %6 = vector.load %arg2[%c0_5, %c0_6] : memref<72x128xf32, #tpu.memory_space<vmem>>, vector<72x128xf32>
    %7 = arith.addf %5, %6 : vector<72x128xf32>
    %cst_7 = arith.constant dense<0.000000e+00> : vector<72xf32>
    %8 = vector.multi_reduction <add>, %7, %cst_7 [1] : vector<72x128xf32> to vector<72xf32>
    %9 = vector.shape_cast %8 : vector<72xf32> to vector<72x1xf32>
    %cst_8 = arith.constant 1.280000e+02 : f32
    %10 = vector.broadcast %cst_8 : f32 to vector<72x1xf32>
    %11 = arith.divf %9, %10 : vector<72x1xf32>
    %12 = arith.mulf %7, %7 : vector<72x128xf32>
    %cst_9 = arith.constant dense<0.000000e+00> : vector<72xf32>
    %13 = vector.multi_reduction <add>, %12, %cst_9 [1] : vector<72x128xf32> to vector<72xf32>
    %14 = vector.shape_cast %13 : vector<72xf32> to vector<72x1xf32>
    %cst_10 = arith.constant 1.280000e+02 : f32
    %15 = vector.broadcast %cst_10 : f32 to vector<72x1xf32>
    %16 = arith.divf %14, %15 : vector<72x1xf32>
    %17 = arith.mulf %11, %11 : vector<72x1xf32>
    %18 = arith.subf %16, %17 : vector<72x1xf32>
    %cst_11 = arith.constant 0.000000e+00 : f32
    %19 = vector.broadcast %cst_11 : f32 to vector<72x1xf32>
    %20 = arith.maximumf %18, %19 : vector<72x1xf32>
    %cst_12 = arith.constant 9.99999996E-13 : f32
    %21 = vector.broadcast %cst_12 : f32 to vector<72x1xf32>
    %22 = arith.addf %20, %21 : vector<72x1xf32>
    %23 = math.rsqrt %22 : vector<72x1xf32>
    %24 = vector.broadcast %11 : vector<72x1xf32> to vector<72x128xf32>
    %25 = arith.subf %7, %24 : vector<72x128xf32>
    %26 = vector.broadcast %23 : vector<72x1xf32> to vector<72x128xf32>
    %27 = arith.mulf %25, %26 : vector<72x128xf32>
    %c0_13 = arith.constant 0 : index
    %c0_14 = arith.constant 0 : index
    %28 = vector.load %arg5[%c0_13, %c0_14] : memref<1x128xf32, #tpu.memory_space<vmem>>, vector<1x128xf32>
    %29 = vector.broadcast %28 : vector<1x128xf32> to vector<72x128xf32>
    %30 = arith.mulf %27, %29 : vector<72x128xf32>
    %c0_15 = arith.constant 0 : index
    %c0_16 = arith.constant 0 : index
    %31 = vector.load %arg6[%c0_15, %c0_16] : memref<1x128xf32, #tpu.memory_space<vmem>>, vector<1x128xf32>
    %32 = vector.broadcast %31 : vector<1x128xf32> to vector<72x128xf32>
    %33 = arith.addf %30, %32 : vector<72x128xf32>
    %c0_17 = arith.constant 0 : index
    %c0_18 = arith.constant 0 : index
    %34 = vector.load %arg7[%c0_17, %c0_18] : memref<72x128xf32, #tpu.memory_space<vmem>>, vector<72x128xf32>
    tpu.vector_store %arg7[%c0_17, %c0_18], %33 {strides = array<i32>} : memref<72x128xf32, #tpu.memory_space<vmem>>, vector<72x128xf32>,
    return
  }
  func.func @transform_0(%arg0: i32) -> (i32, i32) {
    %c0_i32 = arith.constant 0 : i32
    %c0_i32_0 = arith.constant 0 : i32
    return %arg0, %c0_i32 : i32, i32
  }
  func.func @transform_1(%arg0: i32) -> (i32, i32) {
    %c0_i32 = arith.constant 0 : i32
    %c0_i32_0 = arith.constant 0 : i32
    return %arg0, %c0_i32 : i32, i32
  }
  func.func @transform_2(%arg0: i32) -> (i32, i32) {
    %c0_i32 = arith.constant 0 : i32
    %c0_i32_0 = arith.constant 0 : i32
    %c0_i32_1 = arith.constant 0 : i32
    return %c0_i32, %c0_i32_0 : i32, i32
  }
  func.func @transform_3(%arg0: i32) -> (i32, i32) {
    %c0_i32 = arith.constant 0 : i32
    %c0_i32_0 = arith.constant 0 : i32
    %c0_i32_1 = arith.constant 0 : i32
    return %c0_i32, %c0_i32_0 : i32, i32
  }
  func.func @transform_4(%arg0: i32) -> (i32, i32) {
    %c0_i32 = arith.constant 0 : i32
    %c0_i32_0 = arith.constant 0 : i32
    %c0_i32_1 = arith.constant 0 : i32
    return %c0_i32, %c0_i32_0 : i32, i32
  }
  func.func @transform_5(%arg0: i32) -> (i32, i32) {
    %c0_i32 = arith.constant 0 : i32
    %c0_i32_0 = arith.constant 0 : i32
    %c0_i32_1 = arith.constant 0 : i32
    return %c0_i32, %c0_i32_0 : i32, i32
  }
  func.func @transform_6(%arg0: i32) -> (i32, i32) {
    %c0_i32 = arith.constant 0 : i32
    %c0_i32_0 = arith.constant 0 : i32
    return %arg0, %c0_i32 : i32, i32
  }
}

module attributes {stable_mosaic.version = 11 : i64} {
  func.func @_self_output_kernel(%arg0: i32, %arg1: memref<72x128xf32, #tpu.memory_space<vmem>>, %arg2: memref<72x128xf32, #tpu.memory_space<vmem>>, %arg3: memref<128x128xf32, #tpu.memory_space<vmem>>, %arg4: memref<1x128xf32, #tpu.memory_space<vmem>>, %arg5: memref<1x128xf32, #tpu.memory_space<vmem>>, %arg6: memref<1x128xf32, #tpu.memory_space<vmem>>, %arg7: memref<72x128xf32, #tpu.memory_space<vmem>>) attributes {dimension_semantics = [#tpu.dimension_semantics<parallel>], iteration_bounds = array<i64: 2>, scalar_prefetch = 0 : i64, scratch_operands = 0 : i64, tpu.core_type = #tpu.core_type<tc>, window_params = [{transform_indices = @transform_0, window_bounds = array<i64: 72, 128>}, {transform_indices = @transform_1, window_bounds = array<i64: 72, 128>}, {pipeline_mode = #tpu.pipeline_mode<synchronous>, transform_indices = @transform_2, window_bounds = array<i64: 128, 128>}, {pipeline_mode = #tpu.pipeline_mode<synchronous>, transform_indices = @transform_3, window_bounds = array<i64: 1, 128>}, {pipeline_mode = #tpu.pipeline_mode<synchronous>, transform_indices = @transform_4, window_bounds = array<i64: 1, 128>}, {pipeline_mode = #tpu.pipeline_mode<synchronous>, transform_indices = @transform_5, window_bounds = array<i64: 1, 128>}, {transform_indices = @transform_6, window_bounds = array<i64: 72, 128>}]} {
    %c0 = arith.constant 0 : index
    %c0_0 = arith.constant 0 : index
    %0 = vector.load %arg1[%c0, %c0_0] : memref<72x128xf32, #tpu.memory_space<vmem>>, vector<72x128xf32>
    %c0_1 = arith.constant 0 : index
    %c0_2 = arith.constant 0 : index
    %1 = vector.load %arg3[%c0_1, %c0_2] : memref<128x128xf32, #tpu.memory_space<vmem>>, vector<128x128xf32>
    %cst = arith.constant dense<0.000000e+00> : vector<72x128xf32>
    %2 = tpu.matmul %0, %1, %cst {dimension_numbers = #tpu.dot_dimension_numbers<[1], [0], [0], [1], [0, 0, 1, 1], [], []>} : vector<72x128xf32>, vector<128x128xf32>, vector<72x128xf32> -> vector<72x128xf32>
    %c0_3 = arith.constant 0 : index
    %c0_4 = arith.constant 0 : index
    %3 = vector.load %arg4[%c0_3, %c0_4] : memref<1x128xf32, #tpu.memory_space<vmem>>, vector<1x128xf32>
    %4 = vector.broadcast %3 : vector<1x128xf32> to vector<72x128xf32>
    %5 = arith.addf %2, %4 : vector<72x128xf32>
    %c0_5 = arith.constant 0 : index
    %c0_6 = arith.constant 0 : index
    %6 = vector.load %arg2[%c0_5, %c0_6] : memref<72x128xf32, #tpu.memory_space<vmem>>, vector<72x128xf32>
    %7 = arith.addf %5, %6 : vector<72x128xf32>
    %cst_7 = arith.constant dense<0.000000e+00> : vector<72xf32>
    %8 = vector.multi_reduction <add>, %7, %cst_7 [1] : vector<72x128xf32> to vector<72xf32>
    %9 = vector.shape_cast %8 : vector<72xf32> to vector<72x1xf32>
    %cst_8 = arith.constant 1.280000e+02 : f32
    %10 = vector.broadcast %cst_8 : f32 to vector<72x1xf32>
    %11 = arith.divf %9, %10 : vector<72x1xf32>
    %12 = arith.mulf %7, %7 : vector<72x128xf32>
    %cst_9 = arith.constant dense<0.000000e+00> : vector<72xf32>
    %13 = vector.multi_reduction <add>, %12, %cst_9 [1] : vector<72x128xf32> to vector<72xf32>
    %14 = vector.shape_cast %13 : vector<72xf32> to vector<72x1xf32>
    %cst_10 = arith.constant 1.280000e+02 : f32
    %15 = vector.broadcast %cst_10 : f32 to vector<72x1xf32>
    %16 = arith.divf %14, %15 : vector<72x1xf32>
    %17 = arith.mulf %11, %11 : vector<72x1xf32>
    %18 = arith.subf %16, %17 : vector<72x1xf32>
    %cst_11 = arith.constant 0.000000e+00 : f32
    %19 = vector.broadcast %cst_11 : f32 to vector<72x1xf32>
    %20 = arith.maximumf %18, %19 : vector<72x1xf32>
    %cst_12 = arith.constant 9.99999996E-13 : f32
    %21 = vector.broadcast %cst_12 : f32 to vector<72x1xf32>
    %22 = arith.addf %20, %21 : vector<72x1xf32>
    %23 = math.rsqrt %22 : vector<72x1xf32>
    %24 = vector.broadcast %11 : vector<72x1xf32> to vector<72x128xf32>
    %25 = arith.subf %7, %24 : vector<72x128xf32>
    %26 = vector.broadcast %23 : vector<72x1xf32> to vector<72x128xf32>
    %27 = arith.mulf %25, %26 : vector<72x128xf32>
    %c0_13 = arith.constant 0 : index
    %c0_14 = arith.constant 0 : index
    %28 = vector.load %arg5[%c0_13, %c0_14] : memref<1x128xf32, #tpu.memory_space<vmem>>, vector<1x128xf32>
    %29 = vector.broadcast %28 : vector<1x128xf32> to vector<72x128xf32>
    %30 = arith.mulf %27, %29 : vector<72x128xf32>
    %c0_15 = arith.constant 0 : index
    %c0_16 = arith.constant 0 : index
    %31 = vector.load %arg6[%c0_15, %c0_16] : memref<1x128xf32, #tpu.memory_space<vmem>>, vector<1x128xf32>
    %32 = vector.broadcast %31 : vector<1x128xf32> to vector<72x128xf32>
    %33 = arith.addf %30, %32 : vector<72x128xf32>
    %c0_17 = arith.constant 0 : index
    %c0_18 = arith.constant 0 : index
    %34 = vector.load %arg7[%c0_17, %c0_18] : memref<72x128xf32, #tpu.memory_space<vmem>>, vector<72x128xf32>
    tpu.vector_store %arg7[%c0_17, %c0_18], %33 {strides = array<i32>} : memref<72x128xf32, #tpu.memory_space<vmem>>, vector<72x128xf32>,
    return
  }
  func.func @transform_0(%arg0: i32) -> (i32, i32) {
    %c0_i32 = arith.constant 0 : i32
    %c0_i32_0 = arith.constant 0 : i32
    return %arg0, %c0_i32 : i32, i32
  }
  func.func @transform_1(%arg0: i32) -> (i32, i32) {
    %c0_i32 = arith.constant 0 : i32
    %c0_i32_0 = arith.constant 0 : i32
    return %arg0, %c0_i32 : i32, i32
  }
  func.func @transform_2(%arg0: i32) -> (i32, i32) {
    %c0_i32 = arith.constant 0 : i32
    %c0_i32_0 = arith.constant 0 : i32
    %c0_i32_1 = arith.constant 0 : i32
    return %c0_i32, %c0_i32_0 : i32, i32
  }
  func.func @transform_3(%arg0: i32) -> (i32, i32) {
    %c0_i32 = arith.constant 0 : i32
    %c0_i32_0 = arith.constant 0 : i32
    %c0_i32_1 = arith.constant 0 : i32
    return %c0_i32, %c0_i32_0 : i32, i32
  }
  func.func @transform_4(%arg0: i32) -> (i32, i32) {
    %c0_i32 = arith.constant 0 : i32
    %c0_i32_0 = arith.constant 0 : i32
    %c0_i32_1 = arith.constant 0 : i32
    return %c0_i32, %c0_i32_0 : i32, i32
  }
  func.func @transform_5(%arg0: i32) -> (i32, i32) {
    %c0_i32 = arith.constant 0 : i32
    %c0_i32_0 = arith.constant 0 : i32
    %c0_i32_1 = arith.constant 0 : i32
    return %c0_i32, %c0_i32_0 : i32, i32
  }
  func.func @transform_6(%arg0: i32) -> (i32, i32) {
    %c0_i32 = arith.constant 0 : i32
    %c0_i32_0 = arith.constant 0 : i32
    return %arg0, %c0_i32 : i32, i32
  }
}

</mosaic_0001>

<bundles_post_ra>
// kernel: tpu_custom_call.1
= control target key start
LH: loop header
LB: loop body
LE: loop exit
PB: predicated region body
PF: predicated region fallthrough
CT: control target
= control target key end

     0   :  { %s1641_s0 = inlined_call_operand.hbm [shape: f32[144,128], index: 0, kind: input, shape index: {}]   ;;  %s1642_s1 = inlined_call_operand.hbm [shape: f32[144,128], index: 1, kind: input, shape index: {}]   ;;  %s1643_s2 = inlined_call_operand.hbm [shape: f32[128,128], index: 2, kind: input, shape index: {}]   ;;  %s1644_s3 = inlined_call_operand.vmem [shape: f32[1,128], index: 3, kind: input, shape index: {}]   ;;  %s1645_s4 = inlined_call_operand.vmem [shape: f32[1,128], index: 4, kind: input, shape index: {}]   ;;  %s1646_s5 = inlined_call_operand.vmem [shape: f32[1,128], index: 5, kind: input, shape index: {}]   ;;  %s1647_s6 = inlined_call_operand.hbm [shape: f32[144,128], index: 6, kind: output, shape index: {}]  }
   0x1   :  { %1656 = sst [smem:[#allocation14_spill]] %s1641_s0 }
   0x2   :  { %1657 = sst [smem:[#allocation15_spill]] %s1643_s2 }
   0x3   :  { %11 = vsyncpa [#allocation3], 0 }
   0x4   :  { %13 = vsyncpa [#allocation3 + $0x1], 0 }
   0x5   :  { %14 = vsyncpa [#allocation6], 0 }
   0x6   :  { %16 = vsyncpa [#allocation6 + $0x1], 0 }
   0x7   :  { %17 = vsyncpa [#allocation4], 0 }
   0x8   :  { %19 = vsyncpa [#allocation4 + $0x1], 0  ;;  %s1215_s21 = smov 0   ;;  %s1217_s22 = smov 0  }
   0x9   :  { %s1219_s23 = smov 0   ;;  %s1221_s24 = smov 0  }
   0xa LB: > { %s1236_s25 = sadd.s32 4294967295, %s1167_s24   ;;  %s774_s26 = sadd.s32 4294967294, %s1167_s24   ;;  %s1167_s24 = sphi %s1221_s24, %s1682_s24   ;;  %s1163_s23 = sphi %s1219_s23, %s1681_s23   ;;  %s1159_s22 = sphi %s1217_s22, %s1680_s22   ;;  %s1155_s21 = sphi %s1215_s21, %s1679_s21  }
   0xb   : > { %p45_p0 = scmp.ne.s32.totalorder %s1159_s22, %s1155_s21  ;;  %p1648_p1 = scmp.eq.s32.totalorder %s1236_s25, 0 }
   0xc   : > { %p185_p3 = scmp.eq.s32.totalorder %s774_s26, 1  ;;  %p775_p5 = scmp.ge.s32.totalorder %s1167_s24, 1 }
   0xd   : > { %p1245_p4 = por %p1648_p1, %p45_p0  ;;  %p192_p7 = scmp.lt.s32.totalorder %s1167_s24, 3 }
   0xe   : > { %p1250_p6 = por %p185_p3, %p45_p0  ;;  %s1169_s30 = smov [#allocation7]  }
   0xf   : > { %s1658_s27 = scalar_select %p1245_p4, 1, 0 }
  0x10   : > { %s1659_s28 = scalar_select %p1250_p6, 1, 0 }
  0x11   : > { %p1255_p8 = pnand %p775_p5, %p192_p7  ;;  %s204_s7 = sshll.u32 %s1169_s30, 4  ;;  %s1259_s7 = int_to_ptr.vmem [resolvable:$true] %s204_s7 }
  0x12   : > { %s1271_s9 = sadd.s32 1, %s1167_s24   ;;  %s32_s10 = sadd.s32 1, %s1163_s23 }
  0x13   : > { %s1660_s29 = scalar_select %p1255_p8, 1, 0 }
  0x14   : > { %p928_p9 = pneg %p1255_p8  ;;  %s29_s11 = ssub.s32 %s1167_s24, %s1271_s9 }
  0x15   : > { %s1662_s2 = sld [smem:[#allocation15_spill]] }
  0x16   : > { %p1266_p11 = pnand %p928_p9, %p1648_p1 }
  0x18   : > { %p1007_p13 = pneg %p1266_p11 }
  0x1b   : > { %s1005_s14 = scalar_lea.hbm %s1662_s2, 2048 }
  0x1c   : > { %p1006_p12 = scmp.ne.s32.totalorder %s1662_s2, %s1005_s14  ;;  %p1012_p5 = scmp.lt.u32.totalorder %s1005_s14, %s1662_s2 }
  0x1e   : > { %p1008_p0 = pnand %p1007_p13, %p1006_p12 }
  0x20   : > { %p1009_p3 = pneg %p1008_p0 }
  0x22   : > { %p1014_p7 = pnand %p1012_p5, %p1009_p3 }
  0x24   : > { %1017 = shalt.err (!%p1014_p7)
}
  0x25   : > { %s1018_s19 = scalar_lea.vmem %s1259_s7, 2048  ;;  %p1026_p2 = scmp.lt.s32.totalorder %s1259_s7, %s1259_s7 }
  0x26   : > { %p1019_p9 = scmp.ne.s32.totalorder %s1259_s7, %s1018_s19  ;;  %p1027_p6 = scmp.lt.s32.totalorder %s1018_s19, %s1018_s19 }
  0x28   : > { %p1021_p10 = pnand %p1019_p9, %p1007_p13  ;;  %p1028_p4 = por %p1027_p6, %p1026_p2 }
  0x2a   : > { %p1022_p1 = pneg %p1021_p10 }
  0x2c   : > { %p1029_p8 = pnand %p1028_p4, %p1022_p1 }
  0x2e   : > { %1032 = shalt.err (!%p1029_p8)
}
  0x2f   : > { %s1652_s20 = smov 128   ;;  %s1654_s26 = smov 8  }
  0x30   : > { %931 = dma.hbm_to_vmem [thread:$0]  (!%p1266_p11), %s1662_s2, 2048, %s1259_s7, [#allocation6], %s1652_s20, %s1652_s20, %s1654_s26  }
  0x31   : > { %p30_p1 = scmp.eq.s32.totalorder %s29_s11, 0  ;;  %p39_p2 = scmp.ne.s32.totalorder %s1163_s23, %s1159_s22 }
  0x32   : > { %p40_p4 = scmp.eq.s32.totalorder %s1167_s24, 0  ;;  %p944_p6 = scmp.lt.s32.totalorder %s1167_s24, 2 }
  0x33   : > { %s1305_s13 = scalar_select %p30_p1, %s1163_s23, %s32_s10  }
  0x34   : > { %p41_p8 = por %p40_p4, %p39_p2  ;;  %p1664_p10 = scmp.eq.s32.totalorder %s1236_s25, 1 }
  0x35   : > { %1663 = sst [smem:[#allocation13_spill]] %s1305_s13  ;;  %s227_s8 = sand.u32 1, %s1163_s23  }
  0x36   : > { %p1309_p12 = por %p1664_p10, %p39_p2  ;;  %s1651_s15 = smul.u32 1152, %s1167_s24 }
  0x37   : > { %s1315_s16 = smul.u32 72, %s227_s8  ;;  %s1666_s0 = sld [smem:[#allocation14_spill]] }
  0x38   : > { %p1324_p11 = pnand %p944_p6, %p41_p8  ;;  %s1332_s12 = scalar_lea.sflag [#allocation3], %s227_s8 }
  0x39   : > { %s231_s19 = scalar_lea.vmem [#allocation2], %s1315_s16 }
  0x3a   : > { %s238_s30 = sshll.u32 %s231_s19, 4  ;;  %p1035_p0 = pneg %p1324_p11  ;;  %s1330_s30 = int_to_ptr.vmem [resolvable:$true] %s238_s30 }
  0x3d   : > { %s1322_s7 = scalar_lea.hbm %s1666_s0, %s1651_s15  ;;  %s1038_s20 = scalar_lea.hbm %s1666_s0, 2304 }
  0x3e   : > { %s1033_s17 = scalar_lea.hbm %s1322_s7, 1152  ;;  %p1039_p7 = scmp.lt.u32.totalorder %s1322_s7, %s1666_s0 }
  0x3f   : > { %p1034_p13 = scmp.ne.s32.totalorder %s1322_s7, %s1033_s17  ;;  %p1040_p9 = scmp.lt.u32.totalorder %s1038_s20, %s1033_s17 }
  0x40   : > { %p1042_p2 = scmp.lt.u32.totalorder %s1033_s17, %s1322_s7 }
  0x41   : > { %p1036_p3 = pnand %p1035_p0, %p1034_p13  ;;  %p1041_p1 = por %p1040_p9, %p1039_p7 }
  0x43   : > { %p1037_p5 = pneg %p1036_p3  ;;  %p1043_p4 = por %p1042_p2, %p1041_p1 }
  0x45   : > { %p1044_p6 = pnand %p1043_p4, %p1037_p5 }
  0x47   : > { %1047 = shalt.err (!%p1044_p6)
}
  0x48   : > { %s1048_s8 = scalar_lea.vmem %s1330_s30, 1152  ;;  %s1172_s15 = smov [#allocation2]  }
  0x49   : > { %p1049_p8 = scmp.ne.s32.totalorder %s1330_s30, %s1048_s8  ;;  %s1053_s19 = sshll.u32 %s1172_s15, 4  ;;  %s1054_s19 = int_to_ptr.vmem [resolvable:$false] %s1053_s19 }
  0x4a   : > { %s1055_s26 = scalar_lea.vmem %s1054_s19, 2304  ;;  %p1056_p3 = scmp.lt.s32.totalorder %s1330_s30, %s1054_s19 }
  0x4b   : > { %p1051_p10 = pnand %p1049_p8, %p1035_p0  ;;  %p1057_p7 = scmp.lt.s32.totalorder %s1055_s26, %s1048_s8 }
  0x4d   : > { %p1052_p13 = pneg %p1051_p10  ;;  %p1058_p9 = por %p1057_p7, %p1056_p3 }
  0x4f   : > { %p1059_p1 = pnand %p1058_p9, %p1052_p13 }
  0x51   : > { %1062 = shalt.err (!%p1059_p1)
}
  0x52   : > { %s1668_s20 = smov 8   ;;  %s1669_s11 = smov 128  }
  0x53   : > { %935 = dma.hbm_to_vmem [thread:$0]  (!%p1324_p11), %s1322_s7, 1152, %s1330_s30, %s1332_s12, %s1669_s11, %s1669_s11, %s1668_s20  }
  0x54   : > { %s1670_s17 = smul.u32 1152, %s1167_s24  ;;  %s252_s19 = scalar_lea.vmem [#allocation5], %s1315_s16 }
  0x55   : > { %s259_s26 = sshll.u32 %s252_s19, 4  ;;  %s1671_s0 = sand.u32 1, %s1167_s24   ;;  %s1371_s26 = int_to_ptr.vmem [resolvable:$true] %s259_s26 }
  0x56   : > { %s1368_s8 = scalar_lea.hbm %s1642_s1, %s1670_s17  ;;  %s1375_s2 = scalar_lea.sflag [#allocation6], %s1671_s0 }
  0x57   : > { %s1063_s13 = scalar_lea.hbm %s1368_s8, 1152  ;;  %s1068_s12 = scalar_lea.hbm %s1642_s1, 2304 }
  0x58   : > { %p1064_p5 = scmp.ne.s32.totalorder %s1368_s8, %s1063_s13  ;;  %p1069_p6 = scmp.lt.u32.totalorder %s1368_s8, %s1642_s1 }
  0x59   : > { %p1070_p8 = scmp.lt.u32.totalorder %s1068_s12, %s1063_s13  ;;  %p1072_p13 = scmp.lt.u32.totalorder %s1063_s13, %s1368_s8 }
  0x5a   : > { %p1066_p2 = pnand %p1064_p5, %p1035_p0 }
  0x5b   : > { %p1071_p10 = por %p1070_p8, %p1069_p6 }
  0x5c   : > { %p1067_p4 = pneg %p1066_p2 }
  0x5d   : > { %p1073_p3 = por %p1072_p13, %p1071_p10 }
  0x5f   : > { %p1074_p7 = pnand %p1073_p3, %p1067_p4 }
  0x61   : > { %1077 = shalt.err (!%p1074_p7)
}
  0x62   : > { %s1078_s0 = scalar_lea.vmem %s1371_s26, 1152  ;;  %s1173_s16 = smov [#allocation5]  }
  0x63   : > { %p1079_p9 = scmp.ne.s32.totalorder %s1371_s26, %s1078_s0  ;;  %s1083_s15 = sshll.u32 %s1173_s16, 4  ;;  %s1084_s15 = int_to_ptr.vmem [resolvable:$false] %s1083_s15 }
  0x64   : > { %s1085_s19 = scalar_lea.vmem %s1084_s15, 2304  ;;  %p1086_p2 = scmp.lt.s32.totalorder %s1371_s26, %s1084_s15 }
  0x65   : > { %p1081_p1 = pnand %p1079_p9, %p1035_p0  ;;  %p1087_p6 = scmp.lt.s32.totalorder %s1085_s19, %s1078_s0 }
  0x67   : > { %p1082_p5 = pneg %p1081_p1  ;;  %p1088_p8 = por %p1087_p6, %p1086_p2 }
  0x69   : > { %p1089_p10 = pnand %p1088_p8, %p1082_p5 }
  0x6b   : > { %1092 = shalt.err (!%p1089_p10)
}
  0x6c   : > { %938 = dma.hbm_to_vmem [thread:$0]  (!%p1324_p11), %s1368_s8, 1152, %s1371_s26, %s1375_s2, %s1669_s11, %s1669_s11, %s1668_s20  }
  0x6d   : > { %p1672_p0 = scmp.ne.s32.totalorder %s1660_s29, 0 }
  0x6e   : > { %s1407_s13 = sand.u32 (!%p1672_p0), 1, %s1159_s22   ;;  %p1673_p4 = scmp.ne.s32.totalorder (!%p1672_p0), %s1658_s27, 0 }
  0x6f   : > { %271 = sbr.rel (%p1672_p0) target bundleno = 591 (0x24f), region = 44  ;;  %s274_s10 = scalar_lea.sflag (!%p1672_p0), [#allocation3], %s1407_s13 }
  0x70   : > { %s1410_s7 = smul.u32 (!%p1672_p0), 72, %s1407_s13 }
  0x72   : > { %s1414_s30 = scalar_lea.vmem (!%p1672_p0), [#allocation2], %s1410_s7 }
  0x76   : > { %1138 = dma.done.wait (%p1673_p4), %s274_s10, 1152  }
  0x77   : > { %1140 = vsyncadd (%p1673_p4), %s274_s10, 4294966144  ;;  %s282_s2 = sand.u32 1, %s1236_s25   ;;  %s1422_s20 = scalar_lea.vmem [#allocation5], %s1410_s7 }
  0x78   : > { %s283_s29 = scalar_lea.sflag [#allocation6], %s282_s2 }
  0x79   : > { %1142 = dma.done.wait (%p1673_p4), %s283_s29, 1152  }
  0x7a   : > { %1144 = vsyncadd (%p1673_p4), %s283_s29, 4294966144  ;;  %p1674_p11 = scmp.eq.s32.totalorder %s1236_s25, 0 }
  0x7c   : > { %1146 = dma.done.wait (%p1674_p11), [#allocation6], 2048   ;;  %p1675_p13 = pmov %p1674_p11 }
  0x7d   : > { %v1174_v0 = vmov 0.0|0.0   ;;  %vm1175_vm0 = vmmov 0   ;;  %v1176_v1 = vmov 0.0   ;;  %v336_v2 = vld [vmem:[#allocation7] sm:$0xff]  ;;  %v337_v3 = vld [vmem:[#allocation7 + $0x8] sm:$0xff]  ;;  %v338_v4 = vld [vmem:[#allocation7 + $0x10] sm:$0xff] }
  0x7e   : > { %1148 = vsyncadd (%p1675_p13), [#allocation6], 4294965248  ;;  %875 = vmatprep.subr.bf16.mxu0 %v1174_v0  ;;  %899 = vmatprep.subr.bf16.mxu1 %v1174_v0  ;;  %v876_v5 = vpack.c.bf16 %v337_v3, %v336_v2  ;;  %v339_v6 = vld [vmem:[#allocation7 + $0x18] sm:$0xff]  ;;  %v340_v8 = vld [vmem:[#allocation7 + $0x20] sm:$0xff]  ;;  %s1549_s18 = scalar_lea.vmem [#allocation8], %s1410_s7  ;;  %s790_s0 = smul.u32 1152, %s1236_s25 }
  0x7f   : > { %848 = vmatprep.mubr.msk.f32.mxu0 %vm1175_vm0, %v1176_v1  ;;  %863 = vmatprep.mubr.msk.f32.mxu1 %vm1175_vm0, %v1176_v1  ;;  %v879_v7 = vpack.c.bf16 %v339_v6, %v338_v4  ;;  %v341_v9 = vld [vmem:[#allocation7 + $0x28] sm:$0xff]  ;;  %v342_v11 = vld [vmem:[#allocation7 + $0x30] sm:$0xff]  ;;  %v343_v12 = vld [vmem:[#allocation7 + $0x38] sm:$0xff]  ;;  %s669_s16 = sshll.u32 %s1549_s18, 4  ;;  %s656_s25 = scalar_lea.sflag [#allocation4], %s1407_s13  ;;  %s1594_s16 = int_to_ptr.vmem [resolvable:$true] %s669_s16 }
  0x80   : > { %877 = vmatpush3.bf16.msra.mxu0 %v876_v5  ;;  %907 = vmatpush3.bf16.msra.mxu1 %v876_v5  ;;  %v882_v10 = vpack.c.bf16 %v341_v9, %v340_v8  ;;  %v885_v13 = vpack.c.bf16 %v343_v12, %v342_v11  ;;  %v344_v14 = vld [vmem:[#allocation7 + $0x40] sm:$0xff]  ;;  %v345_v15 = vld [vmem:[#allocation7 + $0x48] sm:$0xff]  ;;  %v346_v17 = vld [vmem:[#allocation7 + $0x50] sm:$0xff]  ;;  %s1592_s7 = scalar_lea.hbm %s1647_s6, %s790_s0  ;;  %s1093_s10 = scalar_lea.vmem %s1594_s16, 1152 }
  0x81   : > { %878 = vmatprep.subr.bf16.mxu0 %v1174_v0  ;;  %900 = vmatprep.subr.bf16.mxu1 %v1174_v0  ;;  %v888_v16 = vpack.c.bf16 %v345_v15, %v344_v14  ;;  %v347_v18 = vld [vmem:[#allocation7 + $0x58] sm:$0xff]  ;;  %v348_v20 = vld [vmem:[#allocation7 + $0x60] sm:$0xff]  ;;  %v349_v21 = vld [vmem:[#allocation7 + $0x68] sm:$0xff]  ;;  %p1094_p3 = scmp.ne.s32.totalorder %s1594_s16, %s1093_s10 }
  0x82   : > { %v891_v19 = vpack.c.bf16 %v347_v18, %v346_v17  ;;  %v894_v22 = vpack.c.bf16 %v349_v21, %v348_v20  ;;  %v350_v23 = vld [vmem:[#allocation7 + $0x70] sm:$0xff]  ;;  %v351_v24 = vld [vmem:[#allocation7 + $0x78] sm:$0xff]  ;;  %v327_v26 = vld [vmem:[%s1414_s30] sm:$0xff] }
  0x83   : > { %v897_v25 = vpack.c.bf16 %v351_v24, %v350_v23  ;;  %v332_v27 = vld [vmem:[%s1414_s30 + $0x28] sm:$0xff]  ;;  %v333_v28 = vld [vmem:[%s1414_s30 + $0x30] sm:$0xff]  ;;  %v334_v31 = vld [vmem:[%s1414_s30 + $0x38] sm:$0xff]  ;;  %p1095_p7 = pnand %p1094_p3, %p1309_p12 }
  0x84   : > { %880 = vmatpush3.bf16.msra.mxu0 %v879_v7  ;;  %908 = vmatpush3.bf16.msra.mxu1 %v879_v7  ;;  %v328_v29 = vld [vmem:[%s1414_s30 + $0x8] sm:$0xff]  ;;  %v329_v30 = vld [vmem:[%s1414_s30 + $0x10] sm:$0xff]  ;;  %v335_v32 = vld [vmem:[%s1414_s30 + $0x40] sm:$0xff] }
  0x85   : > { %881 = vmatprep.subr.bf16.mxu0 %v1174_v0  ;;  %901 = vmatprep.subr.bf16.mxu1 %v1174_v0  ;;  %v330_v33 = vld [vmem:[%s1414_s30 + $0x18] sm:$0xff]  ;;  %v331_v34 = vld [vmem:[%s1414_s30 + $0x20] sm:$0xff]  ;;  %v469_v37 = vld [vmem:[%s1422_s20] sm:$0xff]  ;;  %p1096_p9 = pneg %p1095_p7  ;;  %s1177_s30 = smov [#allocation8]  }
  0x86   : > { %v782_v35 = vld [vmem:[%s1644_s3] ss:$0 sm:$0xff]  ;;  %v476_v7 = vld [vmem:[%s1422_s20 + $0x38] sm:$0xff]  ;;  %s1097_s2 = sshll.u32 %s1177_s30, 4  ;;  %s1098_s2 = int_to_ptr.vmem [resolvable:$false] %s1097_s2 }
  0x87   : > { %v474_v39 = vld [vmem:[%s1422_s20 + $0x28] sm:$0xff]  ;;  %v475_v47 = vld [vmem:[%s1422_s20 + $0x30] sm:$0xff]  ;;  %v472_v14 = vld [vmem:[%s1422_s20 + $0x18] sm:$0xff]  ;;  %s1099_s29 = scalar_lea.vmem %s1098_s2, 2304  ;;  %p1100_p1 = scmp.lt.s32.totalorder %s1594_s16, %s1098_s2 }
  0x88   : > { %883 = vmatpush3.bf16.msra.mxu0 %v882_v10  ;;  %909 = vmatpush3.bf16.msra.mxu1 %v882_v10  ;;  %v470_v53 = vld [vmem:[%s1422_s20 + $0x8] sm:$0xff]  ;;  %p1101_p5 = scmp.lt.s32.totalorder %s1099_s29, %s1093_s10 }
  0x89   : > { %884 = vmatprep.subr.bf16.mxu0 %v1174_v0  ;;  %902 = vmatprep.subr.bf16.mxu1 %v1174_v0 }
  0x8a   : > { %p1102_p2 = por %p1101_p5, %p1100_p1 }
  0x8c   : > { %886 = vmatpush3.bf16.msra.mxu0 %v885_v13  ;;  %910 = vmatpush3.bf16.msra.mxu1 %v885_v13  ;;  %v477_v13 = vld [vmem:[%s1422_s20 + $0x40] sm:$0xff]  ;;  %p1103_p6 = pnand %p1102_p2, %p1096_p9 }
  0x8d   : > { %887 = vmatprep.subr.bf16.mxu0 %v1174_v0  ;;  %903 = vmatprep.subr.bf16.mxu1 %v1174_v0 }
  0x90   : > { %889 = vmatpush3.bf16.msra.mxu0 %v888_v16  ;;  %911 = vmatpush3.bf16.msra.mxu1 %v888_v16 }
  0x91   : > { %890 = vmatprep.subr.bf16.mxu0 %v1174_v0  ;;  %904 = vmatprep.subr.bf16.mxu1 %v1174_v0 }
  0x94   : > { %892 = vmatpush3.bf16.msra.mxu0 %v891_v19  ;;  %912 = vmatpush3.bf16.msra.mxu1 %v891_v19  ;;  %v473_v19 = vld [vmem:[%s1422_s20 + $0x20] sm:$0xff] }
  0x95   : > { %893 = vmatprep.subr.bf16.mxu0 %v1174_v0  ;;  %905 = vmatprep.subr.bf16.mxu1 %v1174_v0 }
  0x98   : > { %895 = vmatpush3.bf16.msra.mxu0 %v894_v22  ;;  %913 = vmatpush3.bf16.msra.mxu1 %v894_v22 }
  0x99   : > { %896 = vmatprep.subr.bf16.mxu0 %v1174_v0  ;;  %906 = vmatprep.subr.bf16.mxu1 %v1174_v0  ;;  %v471_v0 = vld [vmem:[%s1422_s20 + $0x10] sm:$0xff] }
  0x9c   : > { %898 = vmatpush3.bf16.msra.mxu0 %v897_v25  ;;  %914 = vmatpush3.bf16.msra.mxu1 %v897_v25 }
  0x9f   : > { %849 = vmatmul.mubr.f32.vlgmr.msra.gmra.mrb[0].mxu0 %v327_v26  ;;  %864 = vmatmul.mubr.f32.vlgmr.msra.gmra.mrb[0].mxu1 %v332_v27 }
  0xa0   : > { %866 = vmatprep.mubr.msk.f32.mxu1 %vm1175_vm0, %v1176_v1  ;;  %851 = vmatprep.mubr.msk.f32.mxu0 %vm1175_vm0, %v1176_v1 }
  0xa3   : > { %867 = vmatmul.mubr.f32.gmra.mrb[2].mxu1 %v333_v28  ;;  %852 = vmatmul.mubr.f32.gmra.mrb[2].mxu0 %v328_v29 }
  0xa4   : > { %854 = vmatprep.mubr.msk.f32.mxu0 %vm1175_vm0, %v1176_v1  ;;  %869 = vmatprep.mubr.msk.f32.mxu1 %vm1175_vm0, %v1176_v1 }
  0xa7   : > { %855 = vmatmul.mubr.f32.gmra.mrb[4].mxu0 %v329_v30  ;;  %870 = vmatmul.mubr.f32.gmra.mrb[4].mxu1 %v334_v31 }
  0xa8   : > { %872 = vmatprep.mubr.msk.f32.mxu1 %vm1175_vm0, %v1176_v1  ;;  %857 = vmatprep.mubr.msk.f32.mxu0 %vm1175_vm0, %v1176_v1 }
  0xab   : > { %873 = vmatmul.mubr.f32.gmra.mrb[6].mxu1 %v335_v32  ;;  %858 = vmatmul.mubr.f32.gmra.mrb[6].mxu0 %v330_v33 }
  0xac   : > { %860 = vmatprep.mubr.msk.f32.mxu0 %vm1175_vm0, %v1176_v1 }
  0xaf   : > { %861 = vmatmul.mubr.f32.gmra.mrb[8].mxu0 %v331_v34 }
 0x172   : > { %v425_v36 = vpop.f32.mrb[0].mxu0  ;;  %v450_v38 = vpop.f32.mrb[0].mxu1 }
 0x173   : > { %v426_v40 = vadd.f32 %v782_v35, %v425_v36  ;;  %v451_v41 = vadd.f32 %v782_v35, %v450_v38  ;;  %v850_v42 = vpop.f32.mrb[1].mxu0  ;;  %v865_v43 = vpop.f32.mrb[1].mxu1 }
 0x175   : > { %v1464_v44 = vadd.f32 %v469_v37, %v426_v40  ;;  %v1466_v45 = vadd.f32 %v474_v39, %v451_v41 }
 0x176   : > { %v455_v46 = vpop.f32.mrb[2].mxu1  ;;  %v430_v48 = vpop.f32.mrb[2].mxu0 }
 0x177   : > { %497 = vadd.xlane.f32.xlu1 %v1466_v45  ;;  %v456_v49 = vadd.f32 %v782_v35, %v455_v46  ;;  %487 = vadd.xlane.f32.xlu0 %v1464_v44  ;;  %v868_v50 = vpop.f32.mrb[3].mxu1  ;;  %v431_v51 = vadd.f32 %v782_v35, %v430_v48  ;;  %v853_v52 = vpop.f32.mrb[3].mxu0  ;;  %v520_v55 = vmul.f32 %v1466_v45, %v1466_v45 }
 0x178   : > { %v515_v56 = vmul.f32 %v1464_v44, %v1464_v44 }
 0x179   : > { %v1472_v54 = vadd.f32 %v475_v47, %v456_v49  ;;  %v1478_v59 = vadd.f32 %v470_v53, %v431_v51 }
 0x17a   : > { %v435_v57 = vpop.f32.mrb[4].mxu0  ;;  %v460_v58 = vpop.f32.mrb[4].mxu1 }
 0x17b   : > { %534 = vadd.xlane.f32.xlu0 %v520_v55  ;;  %524 = vadd.xlane.f32.xlu1 %v515_v56  ;;  %v436_v60 = vadd.f32 %v782_v35, %v435_v57  ;;  %v856_v61 = vpop.f32.mrb[5].mxu0  ;;  %v521_v62 = vmul.f32 %v1472_v54, %v1472_v54  ;;  %v871_v63 = vpop.f32.mrb[5].mxu1  ;;  %v461_v4 = vadd.f32 %v782_v35, %v460_v58 }
 0x17c   : > { %v516_v15 = vmul.f32 %v1478_v59, %v1478_v59 }
 0x17d   : > { %v1483_v3 = vadd.f32 %v471_v0, %v436_v60  ;;  %v1487_v9 = vadd.f32 %v476_v7, %v461_v4 }
 0x17e   : > { %v465_v1 = vpop.f32.mrb[6].mxu1  ;;  %v440_v2 = vpop.f32.mrb[6].mxu0 }
 0x17f   : > { %536 = vadd.xlane.f32.xlu1 %v521_v62  ;;  %489 = vadd.xlane.f32.xlu0 %v1478_v59  ;;  %v874_v5 = vpop.f32.mrb[7].mxu1  ;;  %v859_v6 = vpop.f32.mrb[7].mxu0  ;;  %v466_v10 = vadd.f32 %v782_v35, %v465_v1  ;;  %v441_v11 = vadd.f32 %v782_v35, %v440_v2  ;;  %v517_v20 = vmul.f32 %v1483_v3, %v1483_v3 }
 0x180   : > { %v522_v24 = vmul.f32 %v1487_v9, %v1487_v9 }
 0x181   : > { %v1495_v16 = vadd.f32 %v477_v13, %v466_v10  ;;  %v1498_v17 = vadd.f32 %v472_v14, %v441_v11 }
 0x182   : > { %v445_v8 = vpop.f32.mrb[8].mxu0 }
 0x183   : > { %499 = vadd.xlane.f32.xlu0 %v1472_v54  ;;  %491 = vadd.xlane.f32.xlu1 %v1483_v3  ;;  %v862_v12 = vpop.f32.mrb[9].mxu0  ;;  %v446_v18 = vadd.f32 %v782_v35, %v445_v8  ;;  %v518_v22 = vmul.f32 %v1498_v17, %v1498_v17  ;;  %v523_v25 = vmul.f32 %v1495_v16, %v1495_v16  ;;  %v1533_v8 = vld [vmem:[%s1645_s4] ss:$0 sm:$0xff] }
 0x185   : > { %v1504_v21 = vadd.f32 %v473_v19, %v446_v18 }
 0x187   : > { %526 = vadd.xlane.f32.xlu0 %v516_v15  ;;  %501 = vadd.xlane.f32.xlu1 %v1487_v9  ;;  %v519_v23 = vmul.f32 %v1504_v21, %v1504_v21 }
 0x18b   : > { %503 = vadd.xlane.f32.xlu0 %v1495_v16  ;;  %528 = vadd.xlane.f32.xlu1 %v517_v20 }
 0x18f   : > { %493 = vadd.xlane.f32.xlu1 %v1498_v17  ;;  %530 = vadd.xlane.f32.xlu0 %v518_v22 }
 0x193   : > { %495 = vadd.xlane.f32.xlu0 %v1504_v21  ;;  %532 = vadd.xlane.f32.xlu1 %v519_v23 }
 0x197   : > { %538 = vadd.xlane.f32.xlu0 %v522_v24  ;;  %540 = vadd.xlane.f32.xlu1 %v523_v25 }
 0x204   : > { %v498_v26 = vpop.xlane.xlu1 %497  ;;  %v488_v27 = vpop.xlane.xlu0 %487 }
 0x205   : > { %v511_v28 = vmul.f32 0.0078125, %v498_v26  ;;  %v506_v29 = vmul.f32 0.0078125, %v488_v27 }
 0x207   : > { %v556_v32 = vmul.f32 %v511_v28, %v511_v28  ;;  %v551_v33 = vmul.f32 %v506_v29, %v506_v29  ;;  %v601_v4 = vsub.f32 %v1466_v45, %v511_v28  ;;  %v596_v7 = vsub.f32 %v1464_v44, %v506_v29  ;;  %v1538_v45 = vld [vmem:[%s1646_s5] ss:$0 sm:$0xff] }
 0x208   : > { %v535_v30 = vpop.xlane.xlu0 %534  ;;  %v525_v31 = vpop.xlane.xlu1 %524 }
 0x209   : > { %v547_v34 = vmul.f32 0.0078125, %v535_v30  ;;  %v542_v35 = vmul.f32 0.0078125, %v525_v31 }
 0x20b   : > { %v565_v36 = vsub.f32 %v547_v34, %v556_v32  ;;  %v560_v37 = vsub.f32 %v542_v35, %v551_v33 }
 0x20c   : > { %v537_v38 = vpop.xlane.xlu1 %536  ;;  %v490_v39 = vpop.xlane.xlu0 %489 }
 0x20d   : > { %v574_v40 = vmax.f32 %v565_v36, 0.0  ;;  %v569_v41 = vmax.f32 %v560_v37, 0.0  ;;  %v1516_v48 = vmul.f32 0.0078125, %v490_v39  ;;  %v548_v50 = vmul.f32 0.0078125, %v537_v38 }
 0x20f   : > { %v583_v42 = vadd.f32 1e-12, %v574_v40  ;;  %v578_v43 = vadd.f32 1e-12, %v569_v41  ;;  %v552_v55 = vmul.f32 %v1516_v48, %v1516_v48 }
 0x210   : > { %v500_v46 = vpop.xlane.xlu0 %499  ;;  %v492_v47 = vpop.xlane.xlu1 %491 }
 0x211   : > { %987 = vrsqrt.f32 %v583_v42  ;;  %v1518_v49 = vmul.f32 0.0078125, %v500_v46  ;;  %v1524_v58 = vmul.f32 0.0078125, %v492_v47 }
 0x212   : > { %989 = vrsqrt.f32 %v578_v43 }
 0x213   : > { %v557_v51 = vmul.f32 %v1518_v49, %v1518_v49  ;;  %v553_v5 = vmul.f32 %v1524_v58, %v1524_v58  ;;  %v602_v37 = vsub.f32 %v1472_v54, %v1518_v49 }
 0x214   : > { %v527_v52 = vpop.xlane.xlu0 %526  ;;  %v502_v53 = vpop.xlane.xlu1 %501 }
 0x215   : > { %v566_v56 = vsub.f32 %v548_v50, %v557_v51  ;;  %v543_v57 = vmul.f32 0.0078125, %v527_v52  ;;  %v1543_v26 = vmul.f32 0.0078125, %v502_v53  ;;  %v597_v51 = vsub.f32 %v1478_v59, %v1516_v48 }
 0x216   : > { %v598_v59 = vsub.f32 %v1483_v3, %v1524_v58 }
 0x217   : > { %v575_v60 = vmax.f32 %v566_v56, 0.0  ;;  %v561_v61 = vsub.f32 %v543_v57, %v552_v55  ;;  %v558_v38 = vmul.f32 %v1543_v26, %v1543_v26 }
 0x218   : > { %v504_v62 = vpop.xlane.xlu0 %503  ;;  %v529_v63 = vpop.xlane.xlu1 %528 }
 0x219   : > { %v584_v0 = vadd.f32 1e-12, %v575_v60  ;;  %v570_v1 = vmax.f32 %v561_v61, 0.0  ;;  %v544_v2 = vmul.f32 0.0078125, %v529_v63  ;;  %v1545_v27 = vmul.f32 0.0078125, %v504_v62 }
 0x21b   : > { %v988_v6 = vpop.eup %987  ;;  %991 = vrsqrt.f32 %v584_v0  ;;  %v579_v10 = vadd.f32 1e-12, %v570_v1  ;;  %v562_v13 = vsub.f32 %v544_v2, %v553_v5  ;;  %v559_v39 = vmul.f32 %v1545_v27, %v1545_v27 }
 0x21c   : > { %v990_v11 = vpop.eup %989  ;;  %v610_v12 = vmul.f32 %v988_v6, %v601_v4  ;;  %v494_v14 = vpop.xlane.xlu1 %493 }
 0x21d   : > { %v531_v15 = vpop.xlane.xlu0 %530  ;;  %v605_v18 = vmul.f32 %v990_v11, %v596_v7  ;;  %993 = vrsqrt.f32 %v579_v10  ;;  %v509_v44 = vmul.f32 0.0078125, %v494_v14  ;;  %v571_v20 = vmax.f32 %v562_v13, 0.0 }
 0x21e   : > { %v626_v19 = vmul.f32 %v1533_v8, %v610_v12  ;;  %v545_v24 = vmul.f32 0.0078125, %v531_v15  ;;  %v603_v14 = vsub.f32 %v1487_v9, %v1543_v26 }
 0x21f   : > { %v621_v22 = vmul.f32 %v1533_v8, %v605_v18  ;;  %v554_v23 = vmul.f32 %v509_v44, %v509_v44  ;;  %v580_v28 = vadd.f32 1e-12, %v571_v20  ;;  %v599_v7 = vsub.f32 %v1498_v17, %v509_v44 }
 0x220   : > { %v642_v25 = vadd.f32 %v1538_v45, %v626_v19  ;;  %v533_v30 = vpop.xlane.xlu1 %532  ;;  %v604_v44 = vsub.f32 %v1495_v16, %v1545_v27 }
 0x221   : > { %v496_v29 = vpop.xlane.xlu0 %495  ;;  %v637_v31 = vadd.f32 %v1538_v45, %v621_v22  ;;  %v563_v32 = vsub.f32 %v545_v24, %v554_v23  ;;  %995 = vrsqrt.f32 %v580_v28  ;;  %v546_v36 = vmul.f32 0.0078125, %v533_v30 }
 0x222   : > { %v510_v33 = vmul.f32 0.0078125, %v496_v29  ;;  %651 = vst [vmem:[%s1549_s18 + $0x28] sm:$0xff] %v642_v25 }
 0x223   : > { %646 = vst [vmem:[%s1549_s18] sm:$0xff] %v637_v31  ;;  %v572_v34 = vmax.f32 %v563_v32, 0.0 }
 0x224   : > { %v555_v35 = vmul.f32 %v510_v33, %v510_v33  ;;  %v541_v41 = vpop.xlane.xlu1 %540  ;;  %v600_v12 = vsub.f32 %v1504_v21, %v510_v33 }
 0x225   : > { %v539_v40 = vpop.xlane.xlu0 %538  ;;  %v992_v42 = vpop.eup %991  ;;  %v581_v43 = vadd.f32 1e-12, %v572_v34  ;;  %v550_v50 = vmul.f32 0.0078125, %v541_v41 }
 0x226   : > { %v564_v46 = vsub.f32 %v546_v36, %v555_v35  ;;  %v549_v47 = vmul.f32 0.0078125, %v539_v40  ;;  %v611_v52 = vmul.f32 %v992_v42, %v602_v37 }
 0x227   : > { %v994_v53 = vpop.eup %993  ;;  %997 = vrsqrt.f32 %v581_v43  ;;  %v568_v55 = vsub.f32 %v550_v50, %v559_v39 }
 0x228   : > { %v573_v54 = vmax.f32 %v564_v46, 0.0  ;;  %v567_v49 = vsub.f32 %v549_v47, %v558_v38  ;;  %v627_v56 = vmul.f32 %v1533_v8, %v611_v52  ;;  %v606_v57 = vmul.f32 %v994_v53, %v597_v51 }
 0x229   : > { %v577_v62 = vmax.f32 %v568_v55, 0.0 }
 0x22a   : > { %v582_v60 = vadd.f32 1e-12, %v573_v54  ;;  %v576_v61 = vmax.f32 %v567_v49, 0.0  ;;  %v643_v63 = vadd.f32 %v1538_v45, %v627_v56  ;;  %v622_v0 = vmul.f32 %v1533_v8, %v606_v57 }
 0x22b   : > { %v586_v1 = vadd.f32 1e-12, %v577_v62  ;;  %v996_v2 = vpop.eup %995 }
 0x22c   : > { %999 = vrsqrt.f32 %v582_v60  ;;  %v585_v48 = vadd.f32 1e-12, %v576_v61  ;;  %652 = vst [vmem:[%s1549_s18 + $0x30] sm:$0xff] %v643_v63  ;;  %v638_v4 = vadd.f32 %v1538_v45, %v622_v0  ;;  %v607_v5 = vmul.f32 %v996_v2, %v598_v59 }
 0x22e   : > { %1001 = vrsqrt.f32 %v585_v48  ;;  %647 = vst [vmem:[%s1549_s18 + $0x8] sm:$0xff] %v638_v4  ;;  %v623_v6 = vmul.f32 %v1533_v8, %v607_v5 }
 0x22f   : > { %1003 = vrsqrt.f32 %v586_v1 }
 0x230   : > { %v639_v3 = vadd.f32 %v1538_v45, %v623_v6 }
 0x231   : > { %v998_v10 = vpop.eup %997 }
 0x232   : > { %v608_v58 = vmul.f32 %v998_v10, %v599_v7  ;;  %648 = vst [vmem:[%s1549_s18 + $0x10] sm:$0xff] %v639_v3 }
 0x234   : > { %v624_v11 = vmul.f32 %v1533_v8, %v608_v58 }
 0x236   : > { %v1000_v13 = vpop.eup %999  ;;  %v640_v15 = vadd.f32 %v1538_v45, %v624_v11 }
 0x237   : > { %v609_v18 = vmul.f32 %v1000_v13, %v600_v12 }
 0x238   : > { %v1002_v17 = vpop.eup %1001  ;;  %649 = vst [vmem:[%s1549_s18 + $0x18] sm:$0xff] %v640_v15 }
 0x239   : > { %v1004_v19 = vpop.eup %1003  ;;  %v625_v20 = vmul.f32 %v1533_v8, %v609_v18  ;;  %v612_v21 = vmul.f32 %v1002_v17, %v603_v14 }
 0x23a   : > { %v613_v22 = vmul.f32 %v1004_v19, %v604_v44 }
 0x23b   : > { %v641_v9 = vadd.f32 %v1538_v45, %v625_v20  ;;  %v628_v23 = vmul.f32 %v1533_v8, %v612_v21 }
 0x23c   : > { %v629_v24 = vmul.f32 %v1533_v8, %v613_v22 }
 0x23d   : > { %650 = vst [vmem:[%s1549_s18 + $0x20] sm:$0xff] %v641_v9  ;;  %v644_v16 = vadd.f32 %v1538_v45, %v628_v23 }
 0x23e   : > { %v645_v25 = vadd.f32 %v1538_v45, %v629_v24 }
 0x23f   : > { %653 = vst [vmem:[%s1549_s18 + $0x38] sm:$0xff] %v644_v16 }
 0x240   : > { %654 = vst [vmem:[%s1549_s18 + $0x40] sm:$0xff] %v645_v25 }
 0x241   : > { %1106 = shalt.err (!%p1103_p6)
}
 0x242   : > { %s1107_s20 = scalar_lea.hbm %s1592_s7, 1152  ;;  %s1111_s8 = scalar_lea.hbm %s1647_s6, 2304 }
 0x243   : > { %p1108_p8 = scmp.ne.s32.totalorder %s1592_s7, %s1107_s20  ;;  %p1112_p4 = scmp.lt.u32.totalorder %s1592_s7, %s1647_s6 }
 0x244   : > { %p1113_p11 = scmp.lt.u32.totalorder %s1111_s8, %s1107_s20  ;;  %p1115_p3 = scmp.lt.u32.totalorder %s1107_s20, %s1592_s7 }
 0x245   : > { %p1109_p10 = pnand %p1108_p8, %p1309_p12 }
 0x246   : > { %p1114_p13 = por %p1113_p11, %p1112_p4 }
 0x247   : > { %p1110_p0 = pneg %p1109_p10 }
 0x248   : > { %p1116_p7 = por %p1115_p3, %p1114_p13 }
 0x24a   : > { %p1117_p9 = pnand %p1116_p7, %p1110_p0 }
 0x24c   : > { %1120 = shalt.err (!%p1117_p9)
}
 0x24d   : > { %s1178_s17 = smov 128   ;;  %s1179_s18 = smov 8  }
 0x24e   : > { %926 = dma.vmem_to_hbm [thread:$0]  (%p1309_p12), %s1594_s16, 1152, %s1592_s7, %s656_s25, %s1178_s17, %s1178_s17, %s1179_s18  }
 0x24f PF: > { %s684_s0 = sand.u32 1, %s1155_s21   ;;  %p1676_p1 = scmp.ne.s32.totalorder %s1659_s28, 0 }
 0x250   : > { %p1677_p5 = scmp.ge.s32.totalorder %s1167_s24, 2  ;;  %s685_s15 = scalar_lea.sflag [#allocation4], %s684_s0 }
 0x252   : > { %p940_p2 = pnand %p1677_p5, %p1676_p1 }
 0x254   : > { %1150 = dma.done.wait (!%p940_p2), %s685_s15, 1152  }
 0x255   : > { %1152 = vsyncadd (!%p940_p2), %s685_s15, 4294966144  ;;  %s1678_s19 = sld [smem:[#allocation13_spill]]  ;;  %p22_p6 = scmp.ge.s32.totalorder %s1271_s9, 4  }
 0x256   : > { %s1679_s21 = smov %s1159_s22  ;;  %s1680_s22 = smov %s1163_s23 }
 0x257   : > { %s1682_s24 = smov %s1271_s9  ;;  %24 = sbr.rel (!%p22_p6) target bundleno = 10 (0xa), region = 106 }
 0x25b   : > { %s1681_s23 = smov %s1678_s19 }
 0x25e   :  { %690 = vsyncpa [#allocation3], 1 }
 0x25f   :  { %692 = vsyncpa [#allocation3 + $0x1], 1 }
 0x260   :  { %693 = vsyncpa [#allocation6], 1 }
 0x261   :  { %695 = vsyncpa [#allocation6 + $0x1], 1 }
 0x262   :  { %696 = vsyncpa [#allocation4], 1 }
 0x263   :  { %698 = vsyncpa [#allocation4 + $0x1], 1 }

// kernel: tpu_custom_call.1
= control target key start
LH: loop header
LB: loop body
LE: loop exit
PB: predicated region body
PF: predicated region fallthrough
CT: control target
= control target key end

     0   :  { %s1641_s0 = inlined_call_operand.hbm [shape: f32[144,128], index: 0, kind: input, shape index: {}]   ;;  %s1642_s1 = inlined_call_operand.hbm [shape: f32[144,128], index: 1, kind: input, shape index: {}]   ;;  %s1643_s2 = inlined_call_operand.hbm [shape: f32[128,128], index: 2, kind: input, shape index: {}]   ;;  %s1644_s3 = inlined_call_operand.vmem [shape: f32[1,128], index: 3, kind: input, shape index: {}]   ;;  %s1645_s4 = inlined_call_operand.vmem [shape: f32[1,128], index: 4, kind: input, shape index: {}]   ;;  %s1646_s5 = inlined_call_operand.vmem [shape: f32[1,128], index: 5, kind: input, shape index: {}]   ;;  %s1647_s6 = inlined_call_operand.hbm [shape: f32[144,128], index: 6, kind: output, shape index: {}]  }
   0x1   :  { %1656 = sst [smem:[#allocation14_spill]] %s1641_s0 }
   0x2   :  { %1657 = sst [smem:[#allocation15_spill]] %s1643_s2 }
   0x3   :  { %11 = vsyncpa [#allocation3], 0 }
   0x4   :  { %13 = vsyncpa [#allocation3 + $0x1], 0 }
   0x5   :  { %14 = vsyncpa [#allocation6], 0 }
   0x6   :  { %16 = vsyncpa [#allocation6 + $0x1], 0 }
   0x7   :  { %17 = vsyncpa [#allocation4], 0 }
   0x8   :  { %19 = vsyncpa [#allocation4 + $0x1], 0  ;;  %s1215_s21 = smov 0   ;;  %s1217_s22 = smov 0  }
   0x9   :  { %s1219_s23 = smov 0   ;;  %s1221_s24 = smov 0  }
   0xa LB: > { %s1236_s25 = sadd.s32 4294967295, %s1167_s24   ;;  %s774_s26 = sadd.s32 4294967294, %s1167_s24   ;;  %s1167_s24 = sphi %s1221_s24, %s1682_s24   ;;  %s1163_s23 = sphi %s1219_s23, %s1681_s23   ;;  %s1159_s22 = sphi %s1217_s22, %s1680_s22   ;;  %s1155_s21 = sphi %s1215_s21, %s1679_s21  }
   0xb   : > { %p45_p0 = scmp.ne.s32.totalorder %s1159_s22, %s1155_s21  ;;  %p1648_p1 = scmp.eq.s32.totalorder %s1236_s25, 0 }
   0xc   : > { %p185_p3 = scmp.eq.s32.totalorder %s774_s26, 1  ;;  %p775_p5 = scmp.ge.s32.totalorder %s1167_s24, 1 }
   0xd   : > { %p1245_p4 = por %p1648_p1, %p45_p0  ;;  %p192_p7 = scmp.lt.s32.totalorder %s1167_s24, 3 }
   0xe   : > { %p1250_p6 = por %p185_p3, %p45_p0  ;;  %s1169_s30 = smov [#allocation7]  }
   0xf   : > { %s1658_s27 = scalar_select %p1245_p4, 1, 0 }
  0x10   : > { %s1659_s28 = scalar_select %p1250_p6, 1, 0 }
  0x11   : > { %p1255_p8 = pnand %p775_p5, %p192_p7  ;;  %s204_s7 = sshll.u32 %s1169_s30, 4  ;;  %s1259_s7 = int_to_ptr.vmem [resolvable:$true] %s204_s7 }
  0x12   : > { %s1271_s9 = sadd.s32 1, %s1167_s24   ;;  %s32_s10 = sadd.s32 1, %s1163_s23 }
  0x13   : > { %s1660_s29 = scalar_select %p1255_p8, 1, 0 }
  0x14   : > { %p928_p9 = pneg %p1255_p8  ;;  %s29_s11 = ssub.s32 %s1167_s24, %s1271_s9 }
  0x15   : > { %s1662_s2 = sld [smem:[#allocation15_spill]] }
  0x16   : > { %p1266_p11 = pnand %p928_p9, %p1648_p1 }
  0x18   : > { %p1007_p13 = pneg %p1266_p11 }
  0x1b   : > { %s1005_s14 = scalar_lea.hbm %s1662_s2, 2048 }
  0x1c   : > { %p1006_p12 = scmp.ne.s32.totalorder %s1662_s2, %s1005_s14  ;;  %p1012_p5 = scmp.lt.u32.totalorder %s1005_s14, %s1662_s2 }
  0x1e   : > { %p1008_p0 = pnand %p1007_p13, %p1006_p12 }
  0x20   : > { %p1009_p3 = pneg %p1008_p0 }
  0x22   : > { %p1014_p7 = pnand %p1012_p5, %p1009_p3 }
  0x24   : > { %1017 = shalt.err (!%p1014_p7)
}
  0x25   : > { %s1018_s19 = scalar_lea.vmem %s1259_s7, 2048  ;;  %p1026_p2 = scmp.lt.s32.totalorder %s1259_s7, %s1259_s7 }
  0x26   : > { %p1019_p9 = scmp.ne.s32.totalorder %s1259_s7, %s1018_s19  ;;  %p1027_p6 = scmp.lt.s32.totalorder %s1018_s19, %s1018_s19 }
  0x28   : > { %p1021_p10 = pnand %p1019_p9, %p1007_p13  ;;  %p1028_p4 = por %p1027_p6, %p1026_p2 }
  0x2a   : > { %p1022_p1 = pneg %p1021_p10 }
  0x2c   : > { %p1029_p8 = pnand %p1028_p4, %p1022_p1 }
  0x2e   : > { %1032 = shalt.err (!%p1029_p8)
}
  0x2f   : > { %s1652_s20 = smov 128   ;;  %s1654_s26 = smov 8  }
  0x30   : > { %931 = dma.hbm_to_vmem [thread:$0]  (!%p1266_p11), %s1662_s2, 2048, %s1259_s7, [#allocation6], %s1652_s20, %s1652_s20, %s1654_s26  }
  0x31   : > { %p30_p1 = scmp.eq.s32.totalorder %s29_s11, 0  ;;  %p39_p2 = scmp.ne.s32.totalorder %s1163_s23, %s1159_s22 }
  0x32   : > { %p40_p4 = scmp.eq.s32.totalorder %s1167_s24, 0  ;;  %p944_p6 = scmp.lt.s32.totalorder %s1167_s24, 2 }
  0x33   : > { %s1305_s13 = scalar_select %p30_p1, %s1163_s23, %s32_s10  }
  0x34   : > { %p41_p8 = por %p40_p4, %p39_p2  ;;  %p1664_p10 = scmp.eq.s32.totalorder %s1236_s25, 1 }
  0x35   : > { %1663 = sst [smem:[#allocation13_spill]] %s1305_s13  ;;  %s227_s8 = sand.u32 1, %s1163_s23  }
  0x36   : > { %p1309_p12 = por %p1664_p10, %p39_p2  ;;  %s1651_s15 = smul.u32 1152, %s1167_s24 }
  0x37   : > { %s1315_s16 = smul.u32 72, %s227_s8  ;;  %s1666_s0 = sld [smem:[#allocation14_spill]] }
  0x38   : > { %p1324_p11 = pnand %p944_p6, %p41_p8  ;;  %s1332_s12 = scalar_lea.sflag [#allocation3], %s227_s8 }
  0x39   : > { %s231_s19 = scalar_lea.vmem [#allocation2], %s1315_s16 }
  0x3a   : > { %s238_s30 = sshll.u32 %s231_s19, 4  ;;  %p1035_p0 = pneg %p1324_p11  ;;  %s1330_s30 = int_to_ptr.vmem [resolvable:$true] %s238_s30 }
  0x3d   : > { %s1322_s7 = scalar_lea.hbm %s1666_s0, %s1651_s15  ;;  %s1038_s20 = scalar_lea.hbm %s1666_s0, 2304 }
  0x3e   : > { %s1033_s17 = scalar_lea.hbm %s1322_s7, 1152  ;;  %p1039_p7 = scmp.lt.u32.totalorder %s1322_s7, %s1666_s0 }
  0x3f   : > { %p1034_p13 = scmp.ne.s32.totalorder %s1322_s7, %s1033_s17  ;;  %p1040_p9 = scmp.lt.u32.totalorder %s1038_s20, %s1033_s17 }
  0x40   : > { %p1042_p2 = scmp.lt.u32.totalorder %s1033_s17, %s1322_s7 }
  0x41   : > { %p1036_p3 = pnand %p1035_p0, %p1034_p13  ;;  %p1041_p1 = por %p1040_p9, %p1039_p7 }
  0x43   : > { %p1037_p5 = pneg %p1036_p3  ;;  %p1043_p4 = por %p1042_p2, %p1041_p1 }
  0x45   : > { %p1044_p6 = pnand %p1043_p4, %p1037_p5 }
  0x47   : > { %1047 = shalt.err (!%p1044_p6)
}
  0x48   : > { %s1048_s8 = scalar_lea.vmem %s1330_s30, 1152  ;;  %s1172_s15 = smov [#allocation2]  }
  0x49   : > { %p1049_p8 = scmp.ne.s32.totalorder %s1330_s30, %s1048_s8  ;;  %s1053_s19 = sshll.u32 %s1172_s15, 4  ;;  %s1054_s19 = int_to_ptr.vmem [resolvable:$false] %s1053_s19 }
  0x4a   : > { %s1055_s26 = scalar_lea.vmem %s1054_s19, 2304  ;;  %p1056_p3 = scmp.lt.s32.totalorder %s1330_s30, %s1054_s19 }
  0x4b   : > { %p1051_p10 = pnand %p1049_p8, %p1035_p0  ;;  %p1057_p7 = scmp.lt.s32.totalorder %s1055_s26, %s1048_s8 }
  0x4d   : > { %p1052_p13 = pneg %p1051_p10  ;;  %p1058_p9 = por %p1057_p7, %p1056_p3 }
  0x4f   : > { %p1059_p1 = pnand %p1058_p9, %p1052_p13 }
  0x51   : > { %1062 = shalt.err (!%p1059_p1)
}
  0x52   : > { %s1668_s20 = smov 8   ;;  %s1669_s11 = smov 128  }
  0x53   : > { %935 = dma.hbm_to_vmem [thread:$0]  (!%p1324_p11), %s1322_s7, 1152, %s1330_s30, %s1332_s12, %s1669_s11, %s1669_s11, %s1668_s20  }
  0x54   : > { %s1670_s17 = smul.u32 1152, %s1167_s24  ;;  %s252_s19 = scalar_lea.vmem [#allocation5], %s1315_s16 }
  0x55   : > { %s259_s26 = sshll.u32 %s252_s19, 4  ;;  %s1671_s0 = sand.u32 1, %s1167_s24   ;;  %s1371_s26 = int_to_ptr.vmem [resolvable:$true] %s259_s26 }
  0x56   : > { %s1368_s8 = scalar_lea.hbm %s1642_s1, %s1670_s17  ;;  %s1375_s2 = scalar_lea.sflag [#allocation6], %s1671_s0 }
  0x57   : > { %s1063_s13 = scalar_lea.hbm %s1368_s8, 1152  ;;  %s1068_s12 = scalar_lea.hbm %s1642_s1, 2304 }
  0x58   : > { %p1064_p5 = scmp.ne.s32.totalorder %s1368_s8, %s1063_s13  ;;  %p1069_p6 = scmp.lt.u32.totalorder %s1368_s8, %s1642_s1 }
  0x59   : > { %p1070_p8 = scmp.lt.u32.totalorder %s1068_s12, %s1063_s13  ;;  %p1072_p13 = scmp.lt.u32.totalorder %s1063_s13, %s1368_s8 }
  0x5a   : > { %p1066_p2 = pnand %p1064_p5, %p1035_p0 }
  0x5b   : > { %p1071_p10 = por %p1070_p8, %p1069_p6 }
  0x5c   : > { %p1067_p4 = pneg %p1066_p2 }
  0x5d   : > { %p1073_p3 = por %p1072_p13, %p1071_p10 }
  0x5f   : > { %p1074_p7 = pnand %p1073_p3, %p1067_p4 }
  0x61   : > { %1077 = shalt.err (!%p1074_p7)
}
  0x62   : > { %s1078_s0 = scalar_lea.vmem %s1371_s26, 1152  ;;  %s1173_s16 = smov [#allocation5]  }
  0x63   : > { %p1079_p9 = scmp.ne.s32.totalorder %s1371_s26, %s1078_s0  ;;  %s1083_s15 = sshll.u32 %s1173_s16, 4  ;;  %s1084_s15 = int_to_ptr.vmem [resolvable:$false] %s1083_s15 }
  0x64   : > { %s1085_s19 = scalar_lea.vmem %s1084_s15, 2304  ;;  %p1086_p2 = scmp.lt.s32.totalorder %s1371_s26, %s1084_s15 }
  0x65   : > { %p1081_p1 = pnand %p1079_p9, %p1035_p0  ;;  %p1087_p6 = scmp.lt.s32.totalorder %s1085_s19, %s1078_s0 }
  0x67   : > { %p1082_p5 = pneg %p1081_p1  ;;  %p1088_p8 = por %p1087_p6, %p1086_p2 }
  0x69   : > { %p1089_p10 = pnand %p1088_p8, %p1082_p5 }
  0x6b   : > { %1092 = shalt.err (!%p1089_p10)
}
  0x6c   : > { %938 = dma.hbm_to_vmem [thread:$0]  (!%p1324_p11), %s1368_s8, 1152, %s1371_s26, %s1375_s2, %s1669_s11, %s1669_s11, %s1668_s20  }
  0x6d   : > { %p1672_p0 = scmp.ne.s32.totalorder %s1660_s29, 0 }
  0x6e   : > { %s1407_s13 = sand.u32 (!%p1672_p0), 1, %s1159_s22   ;;  %p1673_p4 = scmp.ne.s32.totalorder (!%p1672_p0), %s1658_s27, 0 }
  0x6f   : > { %271 = sbr.rel (%p1672_p0) target bundleno = 591 (0x24f), region = 44  ;;  %s274_s10 = scalar_lea.sflag (!%p1672_p0), [#allocation3], %s1407_s13 }
  0x70   : > { %s1410_s7 = smul.u32 (!%p1672_p0), 72, %s1407_s13 }
  0x72   : > { %s1414_s30 = scalar_lea.vmem (!%p1672_p0), [#allocation2], %s1410_s7 }
  0x76   : > { %1138 = dma.done.wait (%p1673_p4), %s274_s10, 1152  }
  0x77   : > { %1140 = vsyncadd (%p1673_p4), %s274_s10, 4294966144  ;;  %s282_s2 = sand.u32 1, %s1236_s25   ;;  %s1422_s20 = scalar_lea.vmem [#allocation5], %s1410_s7 }
  0x78   : > { %s283_s29 = scalar_lea.sflag [#allocation6], %s282_s2 }
  0x79   : > { %1142 = dma.done.wait (%p1673_p4), %s283_s29, 1152  }
  0x7a   : > { %1144 = vsyncadd (%p1673_p4), %s283_s29, 4294966144  ;;  %p1674_p11 = scmp.eq.s32.totalorder %s1236_s25, 0 }
  0x7c   : > { %1146 = dma.done.wait (%p1674_p11), [#allocation6], 2048   ;;  %p1675_p13 = pmov %p1674_p11 }
  0x7d   : > { %v1174_v0 = vmov 0.0|0.0   ;;  %vm1175_vm0 = vmmov 0   ;;  %v1176_v1 = vmov 0.0   ;;  %v336_v2 = vld [vmem:[#allocation7] sm:$0xff]  ;;  %v337_v3 = vld [vmem:[#allocation7 + $0x8] sm:$0xff]  ;;  %v338_v4 = vld [vmem:[#allocation7 + $0x10] sm:$0xff] }
  0x7e   : > { %1148 = vsyncadd (%p1675_p13), [#allocation6], 4294965248  ;;  %875 = vmatprep.subr.bf16.mxu0 %v1174_v0  ;;  %899 = vmatprep.subr.bf16.mxu1 %v1174_v0  ;;  %v876_v5 = vpack.c.bf16 %v337_v3, %v336_v2  ;;  %v339_v6 = vld [vmem:[#allocation7 + $0x18] sm:$0xff]  ;;  %v340_v8 = vld [vmem:[#allocation7 + $0x20] sm:$0xff]  ;;  %s1549_s18 = scalar_lea.vmem [#allocation8], %s1410_s7  ;;  %s790_s0 = smul.u32 1152, %s1236_s25 }
  0x7f   : > { %848 = vmatprep.mubr.msk.f32.mxu0 %vm1175_vm0, %v1176_v1  ;;  %863 = vmatprep.mubr.msk.f32.mxu1 %vm1175_vm0, %v1176_v1  ;;  %v879_v7 = vpack.c.bf16 %v339_v6, %v338_v4  ;;  %v341_v9 = vld [vmem:[#allocation7 + $0x28] sm:$0xff]  ;;  %v342_v11 = vld [vmem:[#allocation7 + $0x30] sm:$0xff]  ;;  %v343_v12 = vld [vmem:[#allocation7 + $0x38] sm:$0xff]  ;;  %s669_s16 = sshll.u32 %s1549_s18, 4  ;;  %s656_s25 = scalar_lea.sflag [#allocation4], %s1407_s13  ;;  %s1594_s16 = int_to_ptr.vmem [resolvable:$true] %s669_s16 }
  0x80   : > { %877 = vmatpush3.bf16.msra.mxu0 %v876_v5  ;;  %907 = vmatpush3.bf16.msra.mxu1 %v876_v5  ;;  %v882_v10 = vpack.c.bf16 %v341_v9, %v340_v8  ;;  %v885_v13 = vpack.c.bf16 %v343_v12, %v342_v11  ;;  %v344_v14 = vld [vmem:[#allocation7 + $0x40] sm:$0xff]  ;;  %v345_v15 = vld [vmem:[#allocation7 + $0x48] sm:$0xff]  ;;  %v346_v17 = vld [vmem:[#allocation7 + $0x50] sm:$0xff]  ;;  %s1592_s7 = scalar_lea.hbm %s1647_s6, %s790_s0  ;;  %s1093_s10 = scalar_lea.vmem %s1594_s16, 1152 }
  0x81   : > { %878 = vmatprep.subr.bf16.mxu0 %v1174_v0  ;;  %900 = vmatprep.subr.bf16.mxu1 %v1174_v0  ;;  %v888_v16 = vpack.c.bf16 %v345_v15, %v344_v14  ;;  %v347_v18 = vld [vmem:[#allocation7 + $0x58] sm:$0xff]  ;;  %v348_v20 = vld [vmem:[#allocation7 + $0x60] sm:$0xff]  ;;  %v349_v21 = vld [vmem:[#allocation7 + $0x68] sm:$0xff]  ;;  %p1094_p3 = scmp.ne.s32.totalorder %s1594_s16, %s1093_s10 }
  0x82   : > { %v891_v19 = vpack.c.bf16 %v347_v18, %v346_v17  ;;  %v894_v22 = vpack.c.bf16 %v349_v21, %v348_v20  ;;  %v350_v23 = vld [vmem:[#allocation7 + $0x70] sm:$0xff]  ;;  %v351_v24 = vld [vmem:[#allocation7 + $0x78] sm:$0xff]  ;;  %v327_v26 = vld [vmem:[%s1414_s30] sm:$0xff] }
  0x83   : > { %v897_v25 = vpack.c.bf16 %v351_v24, %v350_v23  ;;  %v332_v27 = vld [vmem:[%s1414_s30 + $0x28] sm:$0xff]  ;;  %v333_v28 = vld [vmem:[%s1414_s30 + $0x30] sm:$0xff]  ;;  %v334_v31 = vld [vmem:[%s1414_s30 + $0x38] sm:$0xff]  ;;  %p1095_p7 = pnand %p1094_p3, %p1309_p12 }
  0x84   : > { %880 = vmatpush3.bf16.msra.mxu0 %v879_v7  ;;  %908 = vmatpush3.bf16.msra.mxu1 %v879_v7  ;;  %v328_v29 = vld [vmem:[%s1414_s30 + $0x8] sm:$0xff]  ;;  %v329_v30 = vld [vmem:[%s1414_s30 + $0x10] sm:$0xff]  ;;  %v335_v32 = vld [vmem:[%s1414_s30 + $0x40] sm:$0xff] }
  0x85   : > { %881 = vmatprep.subr.bf16.mxu0 %v1174_v0  ;;  %901 = vmatprep.subr.bf16.mxu1 %v1174_v0  ;;  %v330_v33 = vld [vmem:[%s1414_s30 + $0x18] sm:$0xff]  ;;  %v331_v34 = vld [vmem:[%s1414_s30 + $0x20] sm:$0xff]  ;;  %v469_v37 = vld [vmem:[%s1422_s20] sm:$0xff]  ;;  %p1096_p9 = pneg %p1095_p7  ;;  %s1177_s30 = smov [#allocation8]  }
  0x86   : > { %v782_v35 = vld [vmem:[%s1644_s3] ss:$0 sm:$0xff]  ;;  %v476_v7 = vld [vmem:[%s1422_s20 + $0x38] sm:$0xff]  ;;  %s1097_s2 = sshll.u32 %s1177_s30, 4  ;;  %s1098_s2 = int_to_ptr.vmem [resolvable:$false] %s1097_s2 }
  0x87   : > { %v474_v39 = vld [vmem:[%s1422_s20 + $0x28] sm:$0xff]  ;;  %v475_v47 = vld [vmem:[%s1422_s20 + $0x30] sm:$0xff]  ;;  %v472_v14 = vld [vmem:[%s1422_s20 + $0x18] sm:$0xff]  ;;  %s1099_s29 = scalar_lea.vmem %s1098_s2, 2304  ;;  %p1100_p1 = scmp.lt.s32.totalorder %s1594_s16, %s1098_s2 }
  0x88   : > { %883 = vmatpush3.bf16.msra.mxu0 %v882_v10  ;;  %909 = vmatpush3.bf16.msra.mxu1 %v882_v10  ;;  %v470_v53 = vld [vmem:[%s1422_s20 + $0x8] sm:$0xff]  ;;  %p1101_p5 = scmp.lt.s32.totalorder %s1099_s29, %s1093_s10 }
  0x89   : > { %884 = vmatprep.subr.bf16.mxu0 %v1174_v0  ;;  %902 = vmatprep.subr.bf16.mxu1 %v1174_v0 }
  0x8a   : > { %p1102_p2 = por %p1101_p5, %p1100_p1 }
  0x8c   : > { %886 = vmatpush3.bf16.msra.mxu0 %v885_v13  ;;  %910 = vmatpush3.bf16.msra.mxu1 %v885_v13  ;;  %v477_v13 = vld [vmem:[%s1422_s20 + $0x40] sm:$0xff]  ;;  %p1103_p6 = pnand %p1102_p2, %p1096_p9 }
  0x8d   : > { %887 = vmatprep.subr.bf16.mxu0 %v1174_v0  ;;  %903 = vmatprep.subr.bf16.mxu1 %v1174_v0 }
  0x90   : > { %889 = vmatpush3.bf16.msra.mxu0 %v888_v16  ;;  %911 = vmatpush3.bf16.msra.mxu1 %v888_v16 }
  0x91   : > { %890 = vmatprep.subr.bf16.mxu0 %v1174_v0  ;;  %904 = vmatprep.subr.bf16.mxu1 %v1174_v0 }
  0x94   : > { %892 = vmatpush3.bf16.msra.mxu0 %v891_v19  ;;  %912 = vmatpush3.bf16.msra.mxu1 %v891_v19  ;;  %v473_v19 = vld [vmem:[%s1422_s20 + $0x20] sm:$0xff] }
  0x95   : > { %893 = vmatprep.subr.bf16.mxu0 %v1174_v0  ;;  %905 = vmatprep.subr.bf16.mxu1 %v1174_v0 }
  0x98   : > { %895 = vmatpush3.bf16.msra.mxu0 %v894_v22  ;;  %913 = vmatpush3.bf16.msra.mxu1 %v894_v22 }
  0x99   : > { %896 = vmatprep.subr.bf16.mxu0 %v1174_v0  ;;  %906 = vmatprep.subr.bf16.mxu1 %v1174_v0  ;;  %v471_v0 = vld [vmem:[%s1422_s20 + $0x10] sm:$0xff] }
  0x9c   : > { %898 = vmatpush3.bf16.msra.mxu0 %v897_v25  ;;  %914 = vmatpush3.bf16.msra.mxu1 %v897_v25 }
  0x9f   : > { %849 = vmatmul.mubr.f32.vlgmr.msra.gmra.mrb[0].mxu0 %v327_v26  ;;  %864 = vmatmul.mubr.f32.vlgmr.msra.gmra.mrb[0].mxu1 %v332_v27 }
  0xa0   : > { %866 = vmatprep.mubr.msk.f32.mxu1 %vm1175_vm0, %v1176_v1  ;;  %851 = vmatprep.mubr.msk.f32.mxu0 %vm1175_vm0, %v1176_v1 }
  0xa3   : > { %867 = vmatmul.mubr.f32.gmra.mrb[2].mxu1 %v333_v28  ;;  %852 = vmatmul.mubr.f32.gmra.mrb[2].mxu0 %v328_v29 }
  0xa4   : > { %854 = vmatprep.mubr.msk.f32.mxu0 %vm1175_vm0, %v1176_v1  ;;  %869 = vmatprep.mubr.msk.f32.mxu1 %vm1175_vm0, %v1176_v1 }
  0xa7   : > { %855 = vmatmul.mubr.f32.gmra.mrb[4].mxu0 %v329_v30  ;;  %870 = vmatmul.mubr.f32.gmra.mrb[4].mxu1 %v334_v31 }
  0xa8   : > { %872 = vmatprep.mubr.msk.f32.mxu1 %vm1175_vm0, %v1176_v1  ;;  %857 = vmatprep.mubr.msk.f32.mxu0 %vm1175_vm0, %v1176_v1 }
  0xab   : > { %873 = vmatmul.mubr.f32.gmra.mrb[6].mxu1 %v335_v32  ;;  %858 = vmatmul.mubr.f32.gmra.mrb[6].mxu0 %v330_v33 }
  0xac   : > { %860 = vmatprep.mubr.msk.f32.mxu0 %vm1175_vm0, %v1176_v1 }
  0xaf   : > { %861 = vmatmul.mubr.f32.gmra.mrb[8].mxu0 %v331_v34 }
 0x172   : > { %v425_v36 = vpop.f32.mrb[0].mxu0  ;;  %v450_v38 = vpop.f32.mrb[0].mxu1 }
 0x173   : > { %v426_v40 = vadd.f32 %v782_v35, %v425_v36  ;;  %v451_v41 = vadd.f32 %v782_v35, %v450_v38  ;;  %v850_v42 = vpop.f32.mrb[1].mxu0  ;;  %v865_v43 = vpop.f32.mrb[1].mxu1 }
 0x175   : > { %v1464_v44 = vadd.f32 %v469_v37, %v426_v40  ;;  %v1466_v45 = vadd.f32 %v474_v39, %v451_v41 }
 0x176   : > { %v455_v46 = vpop.f32.mrb[2].mxu1  ;;  %v430_v48 = vpop.f32.mrb[2].mxu0 }
 0x177   : > { %497 = vadd.xlane.f32.xlu1 %v1466_v45  ;;  %v456_v49 = vadd.f32 %v782_v35, %v455_v46  ;;  %487 = vadd.xlane.f32.xlu0 %v1464_v44  ;;  %v868_v50 = vpop.f32.mrb[3].mxu1  ;;  %v431_v51 = vadd.f32 %v782_v35, %v430_v48  ;;  %v853_v52 = vpop.f32.mrb[3].mxu0  ;;  %v520_v55 = vmul.f32 %v1466_v45, %v1466_v45 }
 0x178   : > { %v515_v56 = vmul.f32 %v1464_v44, %v1464_v44 }
 0x179   : > { %v1472_v54 = vadd.f32 %v475_v47, %v456_v49  ;;  %v1478_v59 = vadd.f32 %v470_v53, %v431_v51 }
 0x17a   : > { %v435_v57 = vpop.f32.mrb[4].mxu0  ;;  %v460_v58 = vpop.f32.mrb[4].mxu1 }
 0x17b   : > { %534 = vadd.xlane.f32.xlu0 %v520_v55  ;;  %524 = vadd.xlane.f32.xlu1 %v515_v56  ;;  %v436_v60 = vadd.f32 %v782_v35, %v435_v57  ;;  %v856_v61 = vpop.f32.mrb[5].mxu0  ;;  %v521_v62 = vmul.f32 %v1472_v54, %v1472_v54  ;;  %v871_v63 = vpop.f32.mrb[5].mxu1  ;;  %v461_v4 = vadd.f32 %v782_v35, %v460_v58 }
 0x17c   : > { %v516_v15 = vmul.f32 %v1478_v59, %v1478_v59 }
 0x17d   : > { %v1483_v3 = vadd.f32 %v471_v0, %v436_v60  ;;  %v1487_v9 = vadd.f32 %v476_v7, %v461_v4 }
 0x17e   : > { %v465_v1 = vpop.f32.mrb[6].mxu1  ;;  %v440_v2 = vpop.f32.mrb[6].mxu0 }
 0x17f   : > { %536 = vadd.xlane.f32.xlu1 %v521_v62  ;;  %489 = vadd.xlane.f32.xlu0 %v1478_v59  ;;  %v874_v5 = vpop.f32.mrb[7].mxu1  ;;  %v859_v6 = vpop.f32.mrb[7].mxu0  ;;  %v466_v10 = vadd.f32 %v782_v35, %v465_v1  ;;  %v441_v11 = vadd.f32 %v782_v35, %v440_v2  ;;  %v517_v20 = vmul.f32 %v1483_v3, %v1483_v3 }
 0x180   : > { %v522_v24 = vmul.f32 %v1487_v9, %v1487_v9 }
 0x181   : > { %v1495_v16 = vadd.f32 %v477_v13, %v466_v10  ;;  %v1498_v17 = vadd.f32 %v472_v14, %v441_v11 }
 0x182   : > { %v445_v8 = vpop.f32.mrb[8].mxu0 }
 0x183   : > { %499 = vadd.xlane.f32.xlu0 %v1472_v54  ;;  %491 = vadd.xlane.f32.xlu1 %v1483_v3  ;;  %v862_v12 = vpop.f32.mrb[9].mxu0  ;;  %v446_v18 = vadd.f32 %v782_v35, %v445_v8  ;;  %v518_v22 = vmul.f32 %v1498_v17, %v1498_v17  ;;  %v523_v25 = vmul.f32 %v1495_v16, %v1495_v16  ;;  %v1533_v8 = vld [vmem:[%s1645_s4] ss:$0 sm:$0xff] }
 0x185   : > { %v1504_v21 = vadd.f32 %v473_v19, %v446_v18 }
 0x187   : > { %526 = vadd.xlane.f32.xlu0 %v516_v15  ;;  %501 = vadd.xlane.f32.xlu1 %v1487_v9  ;;  %v519_v23 = vmul.f32 %v1504_v21, %v1504_v21 }
 0x18b   : > { %503 = vadd.xlane.f32.xlu0 %v1495_v16  ;;  %528 = vadd.xlane.f32.xlu1 %v517_v20 }
 0x18f   : > { %493 = vadd.xlane.f32.xlu1 %v1498_v17  ;;  %530 = vadd.xlane.f32.xlu0 %v518_v22 }
 0x193   : > { %495 = vadd.xlane.f32.xlu0 %v1504_v21  ;;  %532 = vadd.xlane.f32.xlu1 %v519_v23 }
 0x197   : > { %538 = vadd.xlane.f32.xlu0 %v522_v24  ;;  %540 = vadd.xlane.f32.xlu1 %v523_v25 }
 0x204   : > { %v498_v26 = vpop.xlane.xlu1 %497  ;;  %v488_v27 = vpop.xlane.xlu0 %487 }
 0x205   : > { %v511_v28 = vmul.f32 0.0078125, %v498_v26  ;;  %v506_v29 = vmul.f32 0.0078125, %v488_v27 }
 0x207   : > { %v556_v32 = vmul.f32 %v511_v28, %v511_v28  ;;  %v551_v33 = vmul.f32 %v506_v29, %v506_v29  ;;  %v601_v4 = vsub.f32 %v1466_v45, %v511_v28  ;;  %v596_v7 = vsub.f32 %v1464_v44, %v506_v29  ;;  %v1538_v45 = vld [vmem:[%s1646_s5] ss:$0 sm:$0xff] }
 0x208   : > { %v535_v30 = vpop.xlane.xlu0 %534  ;;  %v525_v31 = vpop.xlane.xlu1 %524 }
 0x209   : > { %v547_v34 = vmul.f32 0.0078125, %v535_v30  ;;  %v542_v35 = vmul.f32 0.0078125, %v525_v31 }
 0x20b   : > { %v565_v36 = vsub.f32 %v547_v34, %v556_v32  ;;  %v560_v37 = vsub.f32 %v542_v35, %v551_v33 }
 0x20c   : > { %v537_v38 = vpop.xlane.xlu1 %536  ;;  %v490_v39 = vpop.xlane.xlu0 %489 }
 0x20d   : > { %v574_v40 = vmax.f32 %v565_v36, 0.0  ;;  %v569_v41 = vmax.f32 %v560_v37, 0.0  ;;  %v1516_v48 = vmul.f32 0.0078125, %v490_v39  ;;  %v548_v50 = vmul.f32 0.0078125, %v537_v38 }
 0x20f   : > { %v583_v42 = vadd.f32 1e-12, %v574_v40  ;;  %v578_v43 = vadd.f32 1e-12, %v569_v41  ;;  %v552_v55 = vmul.f32 %v1516_v48, %v1516_v48 }
 0x210   : > { %v500_v46 = vpop.xlane.xlu0 %499  ;;  %v492_v47 = vpop.xlane.xlu1 %491 }
 0x211   : > { %987 = vrsqrt.f32 %v583_v42  ;;  %v1518_v49 = vmul.f32 0.0078125, %v500_v46  ;;  %v1524_v58 = vmul.f32 0.0078125, %v492_v47 }
 0x212   : > { %989 = vrsqrt.f32 %v578_v43 }
 0x213   : > { %v557_v51 = vmul.f32 %v1518_v49, %v1518_v49  ;;  %v553_v5 = vmul.f32 %v1524_v58, %v1524_v58  ;;  %v602_v37 = vsub.f32 %v1472_v54, %v1518_v49 }
 0x214   : > { %v527_v52 = vpop.xlane.xlu0 %526  ;;  %v502_v53 = vpop.xlane.xlu1 %501 }
 0x215   : > { %v566_v56 = vsub.f32 %v548_v50, %v557_v51  ;;  %v543_v57 = vmul.f32 0.0078125, %v527_v52  ;;  %v1543_v26 = vmul.f32 0.0078125, %v502_v53  ;;  %v597_v51 = vsub.f32 %v1478_v59, %v1516_v48 }
 0x216   : > { %v598_v59 = vsub.f32 %v1483_v3, %v1524_v58 }
 0x217   : > { %v575_v60 = vmax.f32 %v566_v56, 0.0  ;;  %v561_v61 = vsub.f32 %v543_v57, %v552_v55  ;;  %v558_v38 = vmul.f32 %v1543_v26, %v1543_v26 }
 0x218   : > { %v504_v62 = vpop.xlane.xlu0 %503  ;;  %v529_v63 = vpop.xlane.xlu1 %528 }
 0x219   : > { %v584_v0 = vadd.f32 1e-12, %v575_v60  ;;  %v570_v1 = vmax.f32 %v561_v61, 0.0  ;;  %v544_v2 = vmul.f32 0.0078125, %v529_v63  ;;  %v1545_v27 = vmul.f32 0.0078125, %v504_v62 }
 0x21b   : > { %v988_v6 = vpop.eup %987  ;;  %991 = vrsqrt.f32 %v584_v0  ;;  %v579_v10 = vadd.f32 1e-12, %v570_v1  ;;  %v562_v13 = vsub.f32 %v544_v2, %v553_v5  ;;  %v559_v39 = vmul.f32 %v1545_v27, %v1545_v27 }
 0x21c   : > { %v990_v11 = vpop.eup %989  ;;  %v610_v12 = vmul.f32 %v988_v6, %v601_v4  ;;  %v494_v14 = vpop.xlane.xlu1 %493 }
 0x21d   : > { %v531_v15 = vpop.xlane.xlu0 %530  ;;  %v605_v18 = vmul.f32 %v990_v11, %v596_v7  ;;  %993 = vrsqrt.f32 %v579_v10  ;;  %v509_v44 = vmul.f32 0.0078125, %v494_v14  ;;  %v571_v20 = vmax.f32 %v562_v13, 0.0 }
 0x21e   : > { %v626_v19 = vmul.f32 %v1533_v8, %v610_v12  ;;  %v545_v24 = vmul.f32 0.0078125, %v531_v15  ;;  %v603_v14 = vsub.f32 %v1487_v9, %v1543_v26 }
 0x21f   : > { %v621_v22 = vmul.f32 %v1533_v8, %v605_v18  ;;  %v554_v23 = vmul.f32 %v509_v44, %v509_v44  ;;  %v580_v28 = vadd.f32 1e-12, %v571_v20  ;;  %v599_v7 = vsub.f32 %v1498_v17, %v509_v44 }
 0x220   : > { %v642_v25 = vadd.f32 %v1538_v45, %v626_v19  ;;  %v533_v30 = vpop.xlane.xlu1 %532  ;;  %v604_v44 = vsub.f32 %v1495_v16, %v1545_v27 }
 0x221   : > { %v496_v29 = vpop.xlane.xlu0 %495  ;;  %v637_v31 = vadd.f32 %v1538_v45, %v621_v22  ;;  %v563_v32 = vsub.f32 %v545_v24, %v554_v23  ;;  %995 = vrsqrt.f32 %v580_v28  ;;  %v546_v36 = vmul.f32 0.0078125, %v533_v30 }
 0x222   : > { %v510_v33 = vmul.f32 0.0078125, %v496_v29  ;;  %651 = vst [vmem:[%s1549_s18 + $0x28] sm:$0xff] %v642_v25 }
 0x223   : > { %646 = vst [vmem:[%s1549_s18] sm:$0xff] %v637_v31  ;;  %v572_v34 = vmax.f32 %v563_v32, 0.0 }
 0x224   : > { %v555_v35 = vmul.f32 %v510_v33, %v510_v33  ;;  %v541_v41 = vpop.xlane.xlu1 %540  ;;  %v600_v12 = vsub.f32 %v1504_v21, %v510_v33 }
 0x225   : > { %v539_v40 = vpop.xlane.xlu0 %538  ;;  %v992_v42 = vpop.eup %991  ;;  %v581_v43 = vadd.f32 1e-12, %v572_v34  ;;  %v550_v50 = vmul.f32 0.0078125, %v541_v41 }
 0x226   : > { %v564_v46 = vsub.f32 %v546_v36, %v555_v35  ;;  %v549_v47 = vmul.f32 0.0078125, %v539_v40  ;;  %v611_v52 = vmul.f32 %v992_v42, %v602_v37 }
 0x227   : > { %v994_v53 = vpop.eup %993  ;;  %997 = vrsqrt.f32 %v581_v43  ;;  %v568_v55 = vsub.f32 %v550_v50, %v559_v39 }
 0x228   : > { %v573_v54 = vmax.f32 %v564_v46, 0.0  ;;  %v567_v49 = vsub.f32 %v549_v47, %v558_v38  ;;  %v627_v56 = vmul.f32 %v1533_v8, %v611_v52  ;;  %v606_v57 = vmul.f32 %v994_v53, %v597_v51 }
 0x229   : > { %v577_v62 = vmax.f32 %v568_v55, 0.0 }
 0x22a   : > { %v582_v60 = vadd.f32 1e-12, %v573_v54  ;;  %v576_v61 = vmax.f32 %v567_v49, 0.0  ;;  %v643_v63 = vadd.f32 %v1538_v45, %v627_v56  ;;  %v622_v0 = vmul.f32 %v1533_v8, %v606_v57 }
 0x22b   : > { %v586_v1 = vadd.f32 1e-12, %v577_v62  ;;  %v996_v2 = vpop.eup %995 }
 0x22c   : > { %999 = vrsqrt.f32 %v582_v60  ;;  %v585_v48 = vadd.f32 1e-12, %v576_v61  ;;  %652 = vst [vmem:[%s1549_s18 + $0x30] sm:$0xff] %v643_v63  ;;  %v638_v4 = vadd.f32 %v1538_v45, %v622_v0  ;;  %v607_v5 = vmul.f32 %v996_v2, %v598_v59 }
 0x22e   : > { %1001 = vrsqrt.f32 %v585_v48  ;;  %647 = vst [vmem:[%s1549_s18 + $0x8] sm:$0xff] %v638_v4  ;;  %v623_v6 = vmul.f32 %v1533_v8, %v607_v5 }
 0x22f   : > { %1003 = vrsqrt.f32 %v586_v1 }
 0x230   : > { %v639_v3 = vadd.f32 %v1538_v45, %v623_v6 }
 0x231   : > { %v998_v10 = vpop.eup %997 }
 0x232   : > { %v608_v58 = vmul.f32 %v998_v10, %v599_v7  ;;  %648 = vst [vmem:[%s1549_s18 + $0x10] sm:$0xff] %v639_v3 }
 0x234   : > { %v624_v11 = vmul.f32 %v1533_v8, %v608_v58 }
 0x236   : > { %v1000_v13 = vpop.eup %999  ;;  %v640_v15 = vadd.f32 %v1538_v45, %v624_v11 }
 0x237   : > { %v609_v18 = vmul.f32 %v1000_v13, %v600_v12 }
 0x238   : > { %v1002_v17 = vpop.eup %1001  ;;  %649 = vst [vmem:[%s1549_s18 + $0x18] sm:$0xff] %v640_v15 }
 0x239   : > { %v1004_v19 = vpop.eup %1003  ;;  %v625_v20 = vmul.f32 %v1533_v8, %v609_v18  ;;  %v612_v21 = vmul.f32 %v1002_v17, %v603_v14 }
 0x23a   : > { %v613_v22 = vmul.f32 %v1004_v19, %v604_v44 }
 0x23b   : > { %v641_v9 = vadd.f32 %v1538_v45, %v625_v20  ;;  %v628_v23 = vmul.f32 %v1533_v8, %v612_v21 }
 0x23c   : > { %v629_v24 = vmul.f32 %v1533_v8, %v613_v22 }
 0x23d   : > { %650 = vst [vmem:[%s1549_s18 + $0x20] sm:$0xff] %v641_v9  ;;  %v644_v16 = vadd.f32 %v1538_v45, %v628_v23 }
 0x23e   : > { %v645_v25 = vadd.f32 %v1538_v45, %v629_v24 }
 0x23f   : > { %653 = vst [vmem:[%s1549_s18 + $0x38] sm:$0xff] %v644_v16 }
 0x240   : > { %654 = vst [vmem:[%s1549_s18 + $0x40] sm:$0xff] %v645_v25 }
 0x241   : > { %1106 = shalt.err (!%p1103_p6)
}
 0x242   : > { %s1107_s20 = scalar_lea.hbm %s1592_s7, 1152  ;;  %s1111_s8 = scalar_lea.hbm %s1647_s6, 2304 }
 0x243   : > { %p1108_p8 = scmp.ne.s32.totalorder %s1592_s7, %s1107_s20  ;;  %p1112_p4 = scmp.lt.u32.totalorder %s1592_s7, %s1647_s6 }
 0x244   : > { %p1113_p11 = scmp.lt.u32.totalorder %s1111_s8, %s1107_s20  ;;  %p1115_p3 = scmp.lt.u32.totalorder %s1107_s20, %s1592_s7 }
 0x245   : > { %p1109_p10 = pnand %p1108_p8, %p1309_p12 }
 0x246   : > { %p1114_p13 = por %p1113_p11, %p1112_p4 }
 0x247   : > { %p1110_p0 = pneg %p1109_p10 }
 0x248   : > { %p1116_p7 = por %p1115_p3, %p1114_p13 }
 0x24a   : > { %p1117_p9 = pnand %p1116_p7, %p1110_p0 }
 0x24c   : > { %1120 = shalt.err (!%p1117_p9)
}
 0x24d   : > { %s1178_s17 = smov 128   ;;  %s1179_s18 = smov 8  }
 0x24e   : > { %926 = dma.vmem_to_hbm [thread:$0]  (%p1309_p12), %s1594_s16, 1152, %s1592_s7, %s656_s25, %s1178_s17, %s1178_s17, %s1179_s18  }
 0x24f PF: > { %s684_s0 = sand.u32 1, %s1155_s21   ;;  %p1676_p1 = scmp.ne.s32.totalorder %s1659_s28, 0 }
 0x250   : > { %p1677_p5 = scmp.ge.s32.totalorder %s1167_s24, 2  ;;  %s685_s15 = scalar_lea.sflag [#allocation4], %s684_s0 }
 0x252   : > { %p940_p2 = pnand %p1677_p5, %p1676_p1 }
 0x254   : > { %1150 = dma.done.wait (!%p940_p2), %s685_s15, 1152  }
 0x255   : > { %1152 = vsyncadd (!%p940_p2), %s685_s15, 4294966144  ;;  %s1678_s19 = sld [smem:[#allocation13_spill]]  ;;  %p22_p6 = scmp.ge.s32.totalorder %s1271_s9, 4  }
 0x256   : > { %s1679_s21 = smov %s1159_s22  ;;  %s1680_s22 = smov %s1163_s23 }
 0x257   : > { %s1682_s24 = smov %s1271_s9  ;;  %24 = sbr.rel (!%p22_p6) target bundleno = 10 (0xa), region = 106 }
 0x25b   : > { %s1681_s23 = smov %s1678_s19 }
 0x25e   :  { %690 = vsyncpa [#allocation3], 1 }
 0x25f   :  { %692 = vsyncpa [#allocation3 + $0x1], 1 }
 0x260   :  { %693 = vsyncpa [#allocation6], 1 }
 0x261   :  { %695 = vsyncpa [#allocation6 + $0x1], 1 }
 0x262   :  { %696 = vsyncpa [#allocation4], 1 }
 0x263   :  { %698 = vsyncpa [#allocation4 + $0x1], 1 }

</bundles_post_ra>
